<compile_context>
chip_gen: v7x
topology: tpu7x:2x2x1
jax: 0.10.0
libtpu: 0.0.40
codegen_flags: <defaults>
</compile_context>

<pallas_src>
import jax
import jax.numpy as jnp
from jax.experimental import pallas as pl
from jax.experimental.pallas import tpu as pltpu

BN_EPS = 1e-5
MXU_DTYPE = jnp.bfloat16          # matmul operand dtype (f32 accumulate); use jnp.float32 for strict parity
VMEM_LIMIT = 32 * 1024 * 1024     # safe on v5e/v6e (128 MiB phys) and v7x (64 MiB phys)


# ----------------------------------------------------------------------------- helpers
def _cpad(c):
    return ((c + 127) // 128) * 128


def _pick_th(h, max_th):
    """Largest divisor of h that is <= max_th (tile height along H)."""
    for cand in range(min(h, max_th), 0, -1):
        if h % cand == 0:
            return cand
    return 1


# ----------------------------------------------------------------------------- kernels
def _conv3x3_kernel(xm_ref, xh1_ref, xh2_ref, w_ref, b_ref, z_ref, st_ref):
    """3x3 stride-1 conv over a pre-padded (zero-ring) NHWC tile + bias, plus
    per-tile (sum, sumsq) BatchNorm partial statistics.

    xm_ref : (1, TH, Wp, Cin)   main rows of the padded input
    xh*_ref: (1, 1,  Wp, Cin)   the two halo rows below the main block
    w_ref  : (9*Cin, Cout)      folded (kh, kw, ci) -> K weights (MXU dtype)
    b_ref  : (1, Cout)          conv bias (f32)
    z_ref  : (1, TH, W, Cout)   pre-BN conv output tile (f32)
    st_ref : (1, 1, 2, Cout)    row0 = sum, row1 = sum of squares over the tile
    """
    th = xm_ref.shape[1]
    wp = xm_ref.shape[2]
    w_out = wp - 2

    # Assemble the (TH+2)-row window and cast once for the MXU.
    xwin = jnp.concatenate([xm_ref[0], xh1_ref[0], xh2_ref[0]], axis=0)   # (TH+2, Wp, Cin)
    xwin = xwin.astype(MXU_DTYPE)

    # Fold the 9 taps into the contraction dimension (single K = 9*Cin matmul).
    taps = []
    for kh in range(3):
        for kw in range(3):
            taps.append(xwin[kh:kh + th, kw:kw + w_out, :])
    patch = jnp.concatenate(taps, axis=-1)                                # (TH, W, 9*Cin)

    acc = jax.lax.dot_general(
        patch, w_ref[...],
        dimension_numbers=(((2,), (0,)), ((), ())),
        preferred_element_type=jnp.float32)                               # (TH, W, Cout) f32
    acc = acc + b_ref[...]

    z_ref[0] = acc

    ssum = jnp.sum(acc, axis=(0, 1))
    ssq = jnp.sum(acc * acc, axis=(0, 1))
    st_ref[0, 0] = jnp.concatenate([ssum[None, :], ssq[None, :]], axis=0)  # (2, Cout)


def _bn_relu_pad_kernel(z_ref, s_ref, t_ref, o_ref):
    """y = relu(z*scale + shift) written into a zero-ringed padded layout
    (N, H+2, W+2, C) so the next conv consumes it without a wrapper jnp.pad."""
    _, h, w, _ = z_ref.shape
    y = jnp.maximum(z_ref[0] * s_ref[...] + t_ref[...], 0.0)
    o_ref[...] = jnp.zeros(o_ref.shape, jnp.float32)
    o_ref[0, 1:h + 1, 1:w + 1, :] = y


def _bn_relu_kernel(z_ref, s_ref, t_ref, o_ref):
    o_ref[...] = jnp.maximum(z_ref[...] * s_ref[...] + t_ref[...], 0.0)


# ----------------------------------------------------------------------------- pallas_call wrappers
def _conv_stage(xp, wfold, bias, th):
    """xp: (N, H+2, W+2, Cin_pad) padded-layout f32 input (zero ring).
    Returns z (N, H, W, Cout_pad) f32 and per-tile stats (N, nH, 2, Cout_pad)."""
    n, hp, wp, cin = xp.shape
    h, w = hp - 2, wp - 2
    k, cout = wfold.shape
    assert k == 9 * cin and cin % 128 == 0 and cout % 128 == 0
    assert h % th == 0
    nh = h // th

    in_specs = [
        pl.BlockSpec((1, th, wp, cin), lambda ni, hi: (ni, hi, 0, 0)),               # main rows
        pl.BlockSpec((1, 1, wp, cin), lambda ni, hi: (ni, (hi + 1) * th, 0, 0)),     # halo row 0
        pl.BlockSpec((1, 1, wp, cin), lambda ni, hi: (ni, (hi + 1) * th + 1, 0, 0)),  # halo row 1
        pl.BlockSpec((k, cout), lambda ni, hi: (0, 0)),                              # folded weights
        pl.BlockSpec((1, cout), lambda ni, hi: (0, 0)),                              # bias
    ]
    out_specs = (
        pl.BlockSpec((1, th, w, cout), lambda ni, hi: (ni, hi, 0, 0)),
        pl.BlockSpec((1, 1, 2, cout), lambda ni, hi: (ni, hi, 0, 0)),
    )
    z, stats = pl.pallas_call(
        _conv3x3_kernel,
        out_shape=(jax.ShapeDtypeStruct((n, h, w, cout), jnp.float32),
                   jax.ShapeDtypeStruct((n, nh, 2, cout), jnp.float32)),
        grid=(n, nh),
        in_specs=in_specs,
        out_specs=out_specs,
        compiler_params=pltpu.CompilerParams(
            dimension_semantics=("parallel", "parallel"),
            vmem_limit_bytes=VMEM_LIMIT),
    )(xp, xp, xp, wfold, bias)
    return z, stats


def _bn_scale_shift(stats, gamma, beta, count):
    """Fold batch statistics into a single per-channel scale/shift (training-mode BN,
    biased variance, matching a freshly constructed nn.BatchNorm2d forward)."""
    s = jnp.sum(stats[:, :, 0, :], axis=(0, 1))
    ss = jnp.sum(stats[:, :, 1, :], axis=(0, 1))
    mean = s / count
    var = jnp.maximum(ss / count - mean * mean, 0.0)
    inv = jax.lax.rsqrt(var + BN_EPS)
    scale = gamma * inv
    shift = beta - mean * scale
    return scale[None, :], shift[None, :]          # (1, C) each


def _bn_relu_pad(z, scale, shift):
    """Apply scale/shift + ReLU and emit the zero-ringed padded layout for the next conv.
    Grid over N only (whole feature map per step).  TODO(synk): H-tile this pass for
    very large feature maps (needs element-offset output blocks)."""
    n, h, w, c = z.shape
    return pl.pallas_call(
        _bn_relu_pad_kernel,
        out_shape=jax.ShapeDtypeStruct((n, h + 2, w + 2, c), jnp.float32),
        grid=(n,),
        in_specs=[pl.BlockSpec((1, h, w, c), lambda ni: (ni, 0, 0, 0)),
                  pl.BlockSpec((1, c), lambda ni: (0, 0)),
                  pl.BlockSpec((1, c), lambda ni: (0, 0))],
        out_specs=pl.BlockSpec((1, h + 2, w + 2, c), lambda ni: (ni, 0, 0, 0)),
        compiler_params=pltpu.CompilerParams(
            dimension_semantics=("parallel",),
            vmem_limit_bytes=VMEM_LIMIT),
    )(z, scale, shift)


def _bn_relu(z, scale, shift, th):
    """Final scale/shift + ReLU, tiled over (N, H-tiles), lane-dense output."""
    n, h, w, c = z.shape
    nh = h // th
    return pl.pallas_call(
        _bn_relu_kernel,
        out_shape=jax.ShapeDtypeStruct((n, h, w, c), jnp.float32),
        grid=(n, nh),
        in_specs=[pl.BlockSpec((1, th, w, c), lambda ni, hi: (ni, hi, 0, 0)),
                  pl.BlockSpec((1, c), lambda ni, hi: (0, 0)),
                  pl.BlockSpec((1, c), lambda ni, hi: (0, 0))],
        out_specs=pl.BlockSpec((1, th, w, c), lambda ni, hi: (ni, hi, 0, 0)),
        compiler_params=pltpu.CompilerParams(
            dimension_semantics=("parallel", "parallel"),
            vmem_limit_bytes=VMEM_LIMIT),
    )(z, scale, shift)


# ----------------------------------------------------------------------------- forward
def upper_step_forward(x_nchw, down_nchw, params, max_th=8):
    """upper_step.forward(x, down_data) — NCHW in / NCHW out."""
    n, c_half, h, w = x_nchw.shape
    h2, w2 = 2 * h, 2 * w
    chp = params["c_half_pad"]
    cout = params["out_channels"]

    # --- ConvTranspose2d(c_half, c_half, k=3, s=2, p=1, output_padding=1) ---
    # Expressed as a stride-1 3x3 conv over the zero-dilated input (x at padded
    # positions (1+2i, 1+2j)) with the spatially flipped, (in,out)-transposed weight.
    x_nhwc = jnp.transpose(x_nchw, (0, 2, 3, 1))
    x_nhwc = jnp.pad(x_nhwc, ((0, 0), (0, 0), (0, 0), (0, chp - c_half)))
    xp_up = jnp.zeros((n, h2 + 2, w2 + 2, chp), jnp.float32)
    xp_up = xp_up.at[:, 1:2 * h:2, 1:2 * w:2, :].set(x_nhwc)
    z_up, _ = _conv_stage(xp_up, params["w_up"], params["b_up"], _pick_th(h2, max_th))

    # --- torch.cat([x_up, down_data], dim=1) -> Dropout(p=0.5) ---
    # TODO(synk): Dropout(p=0.5) uses torch training-mode RNG; applied as identity
    # (eval mode) here since the torch RNG stream cannot be reproduced.
    down_nhwc = jnp.transpose(down_nchw, (0, 2, 3, 1))
    down_nhwc = jnp.pad(down_nhwc, ((0, 0), (0, 0), (0, 0), (0, chp - c_half)))
    xp1 = jnp.zeros((n, h2 + 2, w2 + 2, 2 * chp), jnp.float32)
    xp1 = xp1.at[:, 1:h2 + 1, 1:w2 + 1, :chp].set(z_up)
    xp1 = xp1.at[:, 1:h2 + 1, 1:w2 + 1, chp:].set(down_nhwc)

    th = _pick_th(h2, max_th)
    cnt = float(n * h2 * w2)

    # --- double_convolution stage 1: conv -> BN(batch stats) -> ReLU ---
    z1, st1 = _conv_stage(xp1, params["w1"], params["b1"], th)
    s1, t1 = _bn_scale_shift(st1, params["g1"], params["be1"], cnt)
    xp2 = _bn_relu_pad(z1, s1, t1)          # padded layout; no jnp.pad round trip

    # --- double_convolution stage 2: conv -> BN -> ReLU ---
    z2, st2 = _conv_stage(xp2, params["w2"], params["b2"], th)
    s2, t2 = _bn_scale_shift(st2, params["g2"], params["be2"], cnt)
    y = _bn_relu(z2, s2, t2, th)            # (N, H2, W2, cout_pad)

    y = y[..., :cout]
    return jnp.transpose(y, (0, 3, 1, 2))


# ----------------------------------------------------------------------------- params
def _fold_weight(w_hwio, cin_pad, cout_pad, cin_map=None):
    """(3,3,Cin,Cout) HWIO -> folded (9*cin_pad, cout_pad), zero-padded channels,
    cast to the MXU operand dtype once (saves per-step converts + weight DMA)."""
    _, _, cin, cout = w_hwio.shape
    wp = jnp.zeros((3, 3, cin_pad, cout_pad), jnp.float32)
    if cin_map is None:
        cin_map = [(0, 0, cin)]
    for dst, src, ln in cin_map:
        wp = wp.at[:, :, dst:dst + ln, :cout].set(w_hwio[:, :, src:src + ln, :])
    return wp.reshape(9 * cin_pad, cout_pad).astype(MXU_DTYPE)


def _pad_bias(v, cpad):
    return jnp.zeros((1, cpad), jnp.float32).at[0, :v.shape[0]].set(v)


def _pad_chan(v, cpad):
    return jnp.zeros((cpad,), jnp.float32).at[:v.shape[0]].set(v)


def init_params(key, in_channels, out_channels):
    """Deterministic init mirroring PyTorch default shapes for upper_step."""
    c_half = in_channels // 2
    chp = _cpad(c_half)
    cop = _cpad(out_channels)
    ks = jax.random.split(key, 6)

    def u(k, shape, fan_in):
        b = 1.0 / (fan_in ** 0.5)
        return jax.random.uniform(k, shape, jnp.float32, -b, b)

    # ConvTranspose2d(c_half, c_half, 3, s=2, p=1, output_padding=1): weight (in, out, kh, kw)
    w_up_t = u(ks[0], (c_half, c_half, 3, 3), c_half * 9)
    b_up = u(ks[1], (c_half,), c_half * 9)
    # Conv2d(in_channels, out_channels, 3, p=1): weight (out, in, kh, kw)
    w1_oihw = u(ks[2], (out_channels, in_channels, 3, 3), in_channels * 9)
    b1 = u(ks[3], (out_channels,), in_channels * 9)
    # Conv2d(out_channels, out_channels, 3, p=1)
    w2_oihw = u(ks[4], (out_channels, out_channels, 3, 3), out_channels * 9)
    b2 = u(ks[5], (out_channels,), out_channels * 9)

    # ConvTranspose2d -> equivalent forward-conv weight: transpose (in,out) and flip kh,kw.
    w_up_hwio = jnp.transpose(w_up_t, (2, 3, 0, 1))[::-1, ::-1, :, :]
    w1_hwio = jnp.transpose(w1_oihw, (2, 3, 1, 0))
    w2_hwio = jnp.transpose(w2_oihw, (2, 3, 1, 0))

    # conv1's input is the channel-concat of [up (padded half), down (padded half)].
    cin1_map = [(0, 0, c_half), (chp, c_half, c_half)]

    return {
        "c_half": c_half, "c_half_pad": chp,
        "out_channels": out_channels, "cout_pad": cop,
        "w_up": _fold_weight(w_up_hwio, chp, chp),
        "b_up": _pad_bias(b_up, chp),
        "w1": _fold_weight(w1_hwio, 2 * chp, cop, cin1_map),
        "b1": _pad_bias(b1, cop),
        "g1": _pad_chan(jnp.ones((out_channels,), jnp.float32), cop),   # padded lanes: gamma=0
        "be1": _pad_chan(jnp.zeros((out_channels,), jnp.float32), cop),
        "w2": _fold_weight(w2_hwio, cop, cop),
        "b2": _pad_bias(b2, cop),
        "g2": _pad_chan(jnp.ones((out_channels,), jnp.float32), cop),
        "be2": _pad_chan(jnp.zeros((out_channels,), jnp.float32), cop),
    }


if __name__ == "__main__":
    key = jax.random.PRNGKey(0)
    kx, kd, kp = jax.random.split(key, 3)

    N, in_channels, out_channels = 2, 8, 8      # upper_step(8, 8): up on 4 chans, concat -> 8
    H, W = 8, 8                                  # x is the lower-resolution feature map
    x = jax.random.normal(kx, (N, in_channels // 2, H, W), jnp.float32)           # NCHW
    down = jax.random.normal(kd, (N, in_channels // 2, 2 * H, 2 * W), jnp.float32)  # skip connection

    params = init_params(kp, in_channels, out_channels)
    out = upper_step_forward(x, down, params, max_th=8)
    out = jax.block_until_ready(out)

    assert out.shape == (N, out_channels, 2 * H, 2 * W), out.shape
    assert bool(jnp.all(jnp.isfinite(out)))
    print("KERNEL_OK")
</pallas_src>

<mosaic_0001>
module attributes {stable_mosaic.version = 11 : i64} {
  func.func @_conv3x3_kernel(%arg0: i32, %arg1: i32, %arg2: memref<1x8x18x128xf32, #tpu.memory_space<vmem>>, %arg3: memref<1x1x18x128xf32, #tpu.memory_space<vmem>>, %arg4: memref<1x1x18x128xf32, #tpu.memory_space<vmem>>, %arg5: memref<1152x128xbf16, #tpu.memory_space<vmem>>, %arg6: memref<1x128xf32, #tpu.memory_space<vmem>>, %arg7: memref<1x8x16x128xf32, #tpu.memory_space<vmem>>, %arg8: memref<1x1x2x128xf32, #tpu.memory_space<vmem>>) attributes {dimension_semantics = [#tpu.dimension_semantics<parallel>, #tpu.dimension_semantics<parallel>], iteration_bounds = array<i64: 2, 2>, scalar_prefetch = 0 : i64, scratch_operands = 0 : i64, tpu.core_type = #tpu.core_type<tc>, window_params = [{transform_indices = @transform_0, window_bounds = array<i64: 1, 8, 18, 128>}, {transform_indices = @transform_1, window_bounds = array<i64: 1, 1, 18, 128>}, {transform_indices = @transform_2, window_bounds = array<i64: 1, 1, 18, 128>}, {pipeline_mode = #tpu.pipeline_mode<synchronous>, transform_indices = @transform_3, window_bounds = array<i64: 1152, 128>}, {pipeline_mode = #tpu.pipeline_mode<synchronous>, transform_indices = @transform_4, window_bounds = array<i64: 1, 128>}, {transform_indices = @transform_5, window_bounds = array<i64: 1, 8, 16, 128>}, {transform_indices = @transform_6, window_bounds = array<i64: 1, 1, 2, 128>}]} {
    %c0 = arith.constant 0 : index
    %c0_0 = arith.constant 0 : index
    %c0_1 = arith.constant 0 : index
    %c0_2 = arith.constant 0 : index
    %0 = vector.load %arg2[%c0, %c0_0, %c0_1, %c0_2] : memref<1x8x18x128xf32, #tpu.memory_space<vmem>>, vector<1x8x18x128xf32>
    %1 = vector.shape_cast %0 : vector<1x8x18x128xf32> to vector<8x18x128xf32>
    %c0_3 = arith.constant 0 : index
    %c0_4 = arith.constant 0 : index
    %c0_5 = arith.constant 0 : index
    %c0_6 = arith.constant 0 : index
    %2 = vector.load %arg3[%c0_3, %c0_4, %c0_5, %c0_6] : memref<1x1x18x128xf32, #tpu.memory_space<vmem>>, vector<1x1x18x128xf32>
    %3 = vector.shape_cast %2 : vector<1x1x18x128xf32> to vector<1x18x128xf32>
    %c0_7 = arith.constant 0 : index
    %c0_8 = arith.constant 0 : index
    %c0_9 = arith.constant 0 : index
    %c0_10 = arith.constant 0 : index
    %4 = vector.load %arg4[%c0_7, %c0_8, %c0_9, %c0_10] : memref<1x1x18x128xf32, #tpu.memory_space<vmem>>, vector<1x1x18x128xf32>
    %5 = vector.shape_cast %4 : vector<1x1x18x128xf32> to vector<1x18x128xf32>
    %6 = tpu.concatenate %1, %3, %5 in 0 : vector<8x18x128xf32>, vector<1x18x128xf32>, vector<1x18x128xf32> -> vector<10x18x128xf32>
    %7 = arith.truncf %6 : vector<10x18x128xf32> to vector<10x18x128xbf16>
    %8 = vector.extract_strided_slice %7 {offsets = [0, 0, 0], sizes = [8, 16, 128], strides = [1, 1, 1]} : vector<10x18x128xbf16> to vector<8x16x128xbf16>
    %9 = vector.extract_strided_slice %7 {offsets = [0, 1, 0], sizes = [8, 16, 128], strides = [1, 1, 1]} : vector<10x18x128xbf16> to vector<8x16x128xbf16>
    %10 = vector.extract_strided_slice %7 {offsets = [0, 2, 0], sizes = [8, 16, 128], strides = [1, 1, 1]} : vector<10x18x128xbf16> to vector<8x16x128xbf16>
    %11 = vector.extract_strided_slice %7 {offsets = [1, 0, 0], sizes = [8, 16, 128], strides = [1, 1, 1]} : vector<10x18x128xbf16> to vector<8x16x128xbf16>
    %12 = vector.extract_strided_slice %7 {offsets = [1, 1, 0], sizes = [8, 16, 128], strides = [1, 1, 1]} : vector<10x18x128xbf16> to vector<8x16x128xbf16>
    %13 = vector.extract_strided_slice %7 {offsets = [1, 2, 0], sizes = [8, 16, 128], strides = [1, 1, 1]} : vector<10x18x128xbf16> to vector<8x16x128xbf16>
    %14 = vector.extract_strided_slice %7 {offsets = [2, 0, 0], sizes = [8, 16, 128], strides = [1, 1, 1]} : vector<10x18x128xbf16> to vector<8x16x128xbf16>
    %15 = vector.extract_strided_slice %7 {offsets = [2, 1, 0], sizes = [8, 16, 128], strides = [1, 1, 1]} : vector<10x18x128xbf16> to vector<8x16x128xbf16>
    %16 = vector.extract_strided_slice %7 {offsets = [2, 2, 0], sizes = [8, 16, 128], strides = [1, 1, 1]} : vector<10x18x128xbf16> to vector<8x16x128xbf16>
    %17 = tpu.concatenate %8, %9, %10, %11, %12, %13, %14, %15, %16 in 2 : vector<8x16x128xbf16>, vector<8x16x128xbf16>, vector<8x16x128xbf16>, vector<8x16x128xbf16>, vector<8x16x128xbf16>, vector<8x16x128xbf16>, vector<8x16x128xbf16>, vector<8x16x128xbf16>, vector<8x16x128xbf16> -> vector<8x16x1152xbf16>
    %c0_11 = arith.constant 0 : index
    %c0_12 = arith.constant 0 : index
    %18 = vector.load %arg5[%c0_11, %c0_12] : memref<1152x128xbf16, #tpu.memory_space<vmem>>, vector<1152x128xbf16>
    %cst = arith.constant dense<0.000000e+00> : vector<8x16x128xf32>
    %19 = tpu.matmul %17, %18, %cst {dimension_numbers = #tpu.dot_dimension_numbers<[2], [0], [0, 1], [1], [0, 0, 0, 1, 1, 1], [], []>} : vector<8x16x1152xbf16>, vector<1152x128xbf16>, vector<8x16x128xf32> -> vector<8x16x128xf32>
    %c0_13 = arith.constant 0 : index
    %c0_14 = arith.constant 0 : index
    %20 = vector.load %arg6[%c0_13, %c0_14] : memref<1x128xf32, #tpu.memory_space<vmem>>, vector<1x128xf32>
    %21 = vector.shape_cast %20 : vector<1x128xf32> to vector<1x1x128xf32>
    %22 = vector.broadcast %21 : vector<1x1x128xf32> to vector<8x16x128xf32>
    %23 = arith.addf %19, %22 : vector<8x16x128xf32>
    %c0_15 = arith.constant 0 : index
    %c0_16 = arith.constant 0 : index
    %c0_17 = arith.constant 0 : index
    %c0_18 = arith.constant 0 : index
    %24 = vector.load %arg7[%c0_15, %c0_16, %c0_17, %c0_18] : memref<1x8x16x128xf32, #tpu.memory_space<vmem>>, vector<1x8x16x128xf32>
    %25 = vector.shape_cast %24 : vector<1x8x16x128xf32> to vector<8x16x128xf32>
    %26 = vector.shape_cast %23 : vector<8x16x128xf32> to vector<1x8x16x128xf32>
    tpu.vector_store %arg7[%c0_15, %c0_16, %c0_17, %c0_18], %26 {strides = array<i32>} : memref<1x8x16x128xf32, #tpu.memory_space<vmem>>, vector<1x8x16x128xf32>,
    %cst_19 = arith.constant dense<0.000000e+00> : vector<128xf32>
    %27 = vector.multi_reduction <add>, %23, %cst_19 [0, 1] : vector<8x16x128xf32> to vector<128xf32>
    %28 = arith.mulf %23, %23 : vector<8x16x128xf32>
    %cst_20 = arith.constant dense<0.000000e+00> : vector<128xf32>
    %29 = vector.multi_reduction <add>, %28, %cst_20 [0, 1] : vector<8x16x128xf32> to vector<128xf32>
    %30 = vector.shape_cast %27 : vector<128xf32> to vector<1x128xf32>
    %31 = vector.shape_cast %29 : vector<128xf32> to vector<1x128xf32>
    %32 = tpu.concatenate %30, %31 in 0 : vector<1x128xf32>, vector<1x128xf32> -> vector<2x128xf32>
    %c0_21 = arith.constant 0 : index
    %c0_22 = arith.constant 0 : index
    %c0_23 = arith.constant 0 : index
    %c0_24 = arith.constant 0 : index
    %33 = vector.load %arg8[%c0_21, %c0_22, %c0_23, %c0_24] : memref<1x1x2x128xf32, #tpu.memory_space<vmem>>, vector<1x1x2x128xf32>
    %34 = vector.shape_cast %33 : vector<1x1x2x128xf32> to vector<2x128xf32>
    %35 = vector.shape_cast %32 : vector<2x128xf32> to vector<1x1x2x128xf32>
    tpu.vector_store %arg8[%c0_21, %c0_22, %c0_23, %c0_24], %35 {strides = array<i32>} : memref<1x1x2x128xf32, #tpu.memory_space<vmem>>, vector<1x1x2x128xf32>,
    return
  }
  func.func @transform_0(%arg0: i32, %arg1: i32) -> (i32, i32, i32, i32) {
    %c0_i32 = arith.constant 0 : i32
    %c0_i32_0 = arith.constant 0 : i32
    %c0_i32_1 = arith.constant 0 : i32
    return %arg0, %arg1, %c0_i32, %c0_i32_0 : i32, i32, i32, i32
  }
  func.func @transform_1(%arg0: i32, %arg1: i32) -> (i32, i32, i32, i32) {
    %c1_i32 = arith.constant 1 : i32
    %0 = arith.addi %arg1, %c1_i32 : i32
    %c8_i32 = arith.constant 8 : i32
    %1 = arith.muli %0, %c8_i32 : i32
    %c0_i32 = arith.constant 0 : i32
    %c0_i32_0 = arith.constant 0 : i32
    %c0_i32_1 = arith.constant 0 : i32
    return %arg0, %1, %c0_i32, %c0_i32_0 : i32, i32, i32, i32
  }
  func.func @transform_2(%arg0: i32, %arg1: i32) -> (i32, i32, i32, i32) {
    %c1_i32 = arith.constant 1 : i32
    %0 = arith.addi %arg1, %c1_i32 : i32
    %c8_i32 = arith.constant 8 : i32
    %1 = arith.muli %0, %c8_i32 : i32
    %c1_i32_0 = arith.constant 1 : i32
    %2 = arith.addi %1, %c1_i32_0 : i32
    %c0_i32 = arith.constant 0 : i32
    %c0_i32_1 = arith.constant 0 : i32
    %c0_i32_2 = arith.constant 0 : i32
    return %arg0, %2, %c0_i32, %c0_i32_1 : i32, i32, i32, i32
  }
  func.func @transform_3(%arg0: i32, %arg1: i32) -> (i32, i32) {
    %c0_i32 = arith.constant 0 : i32
    %c0_i32_0 = arith.constant 0 : i32
    %c0_i32_1 = arith.constant 0 : i32
    return %c0_i32, %c0_i32_0 : i32, i32
  }
  func.func @transform_4(%arg0: i32, %arg1: i32) -> (i32, i32) {
    %c0_i32 = arith.constant 0 : i32
    %c0_i32_0 = arith.constant 0 : i32
    %c0_i32_1 = arith.constant 0 : i32
    return %c0_i32, %c0_i32_0 : i32, i32
  }
  func.func @transform_5(%arg0: i32, %arg1: i32) -> (i32, i32, i32, i32) {
    %c0_i32 = arith.constant 0 : i32
    %c0_i32_0 = arith.constant 0 : i32
    %c0_i32_1 = arith.constant 0 : i32
    return %arg0, %arg1, %c0_i32, %c0_i32_0 : i32, i32, i32, i32
  }
  func.func @transform_6(%arg0: i32, %arg1: i32) -> (i32, i32, i32, i32) {
    %c0_i32 = arith.constant 0 : i32
    %c0_i32_0 = arith.constant 0 : i32
    %c0_i32_1 = arith.constant 0 : i32
    return %arg0, %arg1, %c0_i32, %c0_i32_0 : i32, i32, i32, i32
  }
}

</mosaic_0001>

<bundles_post_ra>
// kernel: tpu_custom_call.1
= control target key start
LH: loop header
LB: loop body
LE: loop exit
PB: predicated region body
PF: predicated region fallthrough
CT: control target
= control target key end

     0   :  { %12 = vsyncpa [#allocation3], 0  ;;  %s3562_s0 = inlined_call_operand.vmem [shape: f32[2,18,18,128], index: 0, kind: input, shape index: {}]   ;;  %s3563_s1 = inlined_call_operand.vmem [shape: f32[2,18,18,128], index: 1, kind: input, shape index: {}]   ;;  %s3564_s2 = inlined_call_operand.vmem [shape: f32[2,18,18,128], index: 2, kind: input, shape index: {}]   ;;  %s3565_s3 = inlined_call_operand.vmem [shape: bf16[1152,128], index: 3, kind: input, shape index: {}]   ;;  %s3566_s4 = inlined_call_operand.vmem [shape: f32[1,128], index: 4, kind: input, shape index: {}]   ;;  %s3567_s5 = inlined_call_operand.hbm [shape: f32[2,16,16,128], index: 5, kind: output, shape index: {0}]   ;;  %s3568_s6 = inlined_call_operand.hbm [shape: f32[2,2,2,128], index: 6, kind: output, shape index: {1}]  }
   0x1   :  { %14 = vsyncpa [#allocation3 + $0x1], 0 }
   0x2   :  { %15 = vsyncpa [#allocation5], 0 }
   0x3   :  { %17 = vsyncpa [#allocation5 + $0x1], 0  ;;  %s2765_s21 = smov 0   ;;  %s2767_s22 = smov 0  }
   0x4   :  { %s2769_s23 = smov 0   ;;  %s2771_s24 = smov 0  }
   0x5   :  { %s2773_s25 = smov 0   ;;  %s2775_s26 = smov 0  }
   0x6   :  { %s2777_s27 = smov 0   ;;  %s2779_s28 = smov 0  }
   0x7 LB: > { %3572 = sst [smem:[#allocation8_spill]] %s2720_s27  ;;  %s2011_s29 = sadd.s32 4294967295, %s2724_s28   ;;  %s2724_s28 = sphi %s2779_s28, %s23_s28   ;;  %s2720_s27 = sphi %s2777_s27, %s3580_s27   ;;  %s2716_s26 = sphi %s2775_s26, %s3585_s26   ;;  %s2712_s25 = sphi %s2773_s25, %s3578_s25   ;;  %s2708_s24 = sphi %s2771_s24, %s3584_s24   ;;  %s2704_s23 = sphi %s2769_s23, %s3583_s23   ;;  %s2700_s22 = sphi %s2767_s22, %s3582_s22   ;;  %s2696_s21 = sphi %s2765_s21, %s3581_s21  }
   0x8   : > { %s2012_s30 = sadd.s32 4294967294, %s2724_s28   ;;  %s32_s7 = sadd.s32 1, %s2716_s26 }
   0x9   : > { %p33_p0 = scmp.ge.s32.totalorder %s32_s7, 2  ;;  %s35_s8 = sadd.s32 1, %s2720_s27 }
   0xa   : > { %p190_p1 = scmp.ne.s32.totalorder %s2704_s23, %s2700_s22  ;;  %p191_p2 = scmp.eq.s32.totalorder %s2011_s29, 3 }
   0xb   : > { %s3587_s7 = smov (%p33_p0, %s32_s7), 0  ;;  %s3589_s8 = smov (!%p33_p0, %s35_s8), %s2720_s27 }
   0xc   : > { %3573 = sst [smem:[#allocation9_spill]] %s3587_s7  ;;  %s176_s9 = ssub.s32 %s2716_s26, %s3587_s7 }
   0xd   : > { %p2816_p3 = por %p191_p2, %p190_p1  ;;  %p37_p4 = scmp.ge.s32.totalorder %s3589_s8, 2 }
   0xe   : > { %p196_p5 = scmp.ne.s32.totalorder %s2700_s22, %s2696_s21  ;;  %p197_p6 = scmp.eq.s32.totalorder %s2012_s30, 3 }
   0xf   : > { %p2019_p7 = scmp.ge.s32.totalorder %s2724_s28, 1  ;;  %s3591_s8 = smov (%p37_p4, %s3589_s8), 0 }
  0x10   : > { %3575 = sst [smem:[#allocation10_spill]] %s3591_s8  ;;  %p2825_p8 = por %p197_p6, %p196_p5 }
  0x11   : > { %p307_p9 = scmp.lt.s32.totalorder %s2724_s28, 5  ;;  %s175_s12 = ssub.s32 %s2720_s27, %s3591_s8 }
  0x12   : > { %s180_s13 = sadd.s32 1, %s2704_s23  ;;  %s177_s14 = sor.u32 %s176_s9, %s175_s12 }
  0x13   : > { %p308_p10 = pnand %p2019_p7, %p307_p9  ;;  %p178_p11 = scmp.eq.s32.totalorder %s177_s14, 0 }
  0x14   : > { %v2526_v0 = vld [vmem:[%s3565_s3 + $0x40] sm:$0xff] (!%p308_p10)   ;;  %v2530_v4 = vld [vmem:[%s3565_s3 + $0x48] sm:$0xff] (!%p308_p10)   ;;  %v2534_v8 = vld [vmem:[%s3565_s3 + $0x50] sm:$0xff] (!%p308_p10)   ;;  %s2864_s9 = sshll.u32 (!%p308_p10), %s2708_s24, 3  ;;  %p381_p12 = scmp.lt.s32.totalorder (!%p308_p10), %s2712_s25, 1  ;;  %vm597_vm0 = vcmask (!%p308_p10), 1046528  }
  0x15   : > { %s2834_s15 = scalar_select %p178_p11, %s2704_s23, %s180_s13  }
  0x16   : > { %311 = sbr.rel (%p308_p10) target bundleno = 472 (0x1d8), region = 40  ;;  %v2527_v1 = vld [vmem:[%s3565_s3 + $0xc0] sm:$0xff] (!%p308_p10)   ;;  %2124 = vmatprep.subr.bf16.mxu0 (!%p308_p10), %v2526_v0  ;;  %v2531_v5 = vld [vmem:[%s3565_s3 + $0xc8] sm:$0xff] (!%p308_p10)   ;;  %v2535_v9 = vld [vmem:[%s3565_s3 + $0xd0] sm:$0xff] (!%p308_p10)   ;;  %p383_p13 = scmp.lt.s32.totalorder (!%p308_p10), %s2864_s9, 17 }
  0x17   : > { %v2528_v2 = vld [vmem:[%s3565_s3] sm:$0xff] (!%p308_p10)   ;;  %2188 = vmatprep.subr.bf16.mxu1 (!%p308_p10), %v2527_v1  ;;  %v2532_v6 = vld [vmem:[%s3565_s3 + $0x8] sm:$0xff] (!%p308_p10)   ;;  %v2536_v10 = vld [vmem:[%s3565_s3 + $0x10] sm:$0xff] (!%p308_p10)   ;;  %vm476_vm1 = vsmask.f32 (!%p308_p10), 7424  ;;  %s3028_s27 = sadd.s32 (!%p308_p10), 8, %s2864_s9 }
  0x18   : > { %v2529_v3 = vld [vmem:[%s3565_s3 + $0x80] sm:$0xff] (!%p308_p10)   ;;  %2125 = vmatpush3.bf16.msra.mxu0 (!%p308_p10), %v2528_v2  ;;  %v2533_v7 = vld [vmem:[%s3565_s3 + $0x88] sm:$0xff] (!%p308_p10)   ;;  %v2537_v11 = vld [vmem:[%s3565_s3 + $0x90] sm:$0xff] (!%p308_p10)   ;;  %s411_s17 = sadd.s32 (!%p308_p10), 1, %s3028_s27  ;;  %p400_p0 = scmp.lt.s32.totalorder (!%p308_p10), %s3028_s27, 17 }
  0x19   : > { %2189 = vmatpush3.bf16.msra.mxu1 (!%p308_p10), %v2529_v3  ;;  %2126 = vmatprep.subr.bf16.mxu0 (!%p308_p10), %v2530_v4  ;;  %v2538_v12 = vld [vmem:[%s3565_s3 + $0x58] sm:$0xff] (!%p308_p10)   ;;  %v2542_v16 = vld [vmem:[%s3565_s3 + $0x60] sm:$0xff] (!%p308_p10)   ;;  %v2546_v20 = vld [vmem:[%s3565_s3 + $0x68] sm:$0xff] (!%p308_p10)   ;;  %p3053_p1 = scmp.lt.s32.totalorder (!%p308_p10), %s411_s17, 17  ;;  %s2726_s7 = smov (!%p308_p10), [#allocation2]  }
  0x1a   : > { %2190 = vmatprep.subr.bf16.mxu1 (!%p308_p10), %v2531_v5  ;;  %v2539_v13 = vld [vmem:[%s3565_s3 + $0xd8] sm:$0xff] (!%p308_p10)   ;;  %v2543_v17 = vld [vmem:[%s3565_s3 + $0xe0] sm:$0xff] (!%p308_p10)   ;;  %v2547_v21 = vld [vmem:[%s3565_s3 + $0xe8] sm:$0xff] (!%p308_p10)  }
  0x1b   : > { %v2540_v14 = vld [vmem:[%s3565_s3 + $0x18] sm:$0xff] (!%p308_p10)   ;;  %v2544_v18 = vld [vmem:[%s3565_s3 + $0x20] sm:$0xff] (!%p308_p10)   ;;  %v2548_v22 = vld [vmem:[%s3565_s3 + $0x28] sm:$0xff] (!%p308_p10)  }
  0x1c   : > { %2127 = vmatpush3.bf16.msra.mxu0 (!%p308_p10), %v2532_v6  ;;  %v2541_v15 = vld [vmem:[%s3565_s3 + $0x98] sm:$0xff] (!%p308_p10)   ;;  %v2545_v19 = vld [vmem:[%s3565_s3 + $0xa0] sm:$0xff] (!%p308_p10)   ;;  %v2549_v23 = vld [vmem:[%s3565_s3 + $0xa8] sm:$0xff] (!%p308_p10)  }
  0x1d   : > { %2191 = vmatpush3.bf16.msra.mxu1 %v2533_v7  ;;  %2128 = vmatprep.subr.bf16.mxu0 %v2534_v8  ;;  %s382_s14 = scalar_select %p381_p12, %s2712_s25, 1  ;;  %v2550_v24 = vld [vmem:[%s3565_s3 + $0x70] sm:$0xff]   ;;  %v2554_v28 = vld [vmem:[%s3565_s3 + $0x78] sm:$0xff]   ;;  %v2558_v40 = vld [vmem:[%s3565_s3 + $0x140] sm:$0xff]  }
  0x1e   : > { %2192 = vmatprep.subr.bf16.mxu1 %v2535_v9  ;;  %s384_s18 = scalar_select %p383_p13, %s2864_s9, 17  ;;  %v2551_v25 = vld [vmem:[%s3565_s3 + $0xf0] sm:$0xff]   ;;  %v2555_v29 = vld [vmem:[%s3565_s3 + $0xf8] sm:$0xff]   ;;  %v2559_v55 = vld [vmem:[%s3565_s3 + $0x100] sm:$0xff]  }
  0x1f   : > { %s2900_s8 = smul.u32 54, %s382_s14  ;;  %v2552_v26 = vld [vmem:[%s3565_s3 + $0x30] sm:$0xff]   ;;  %v2556_v30 = vld [vmem:[%s3565_s3 + $0x38] sm:$0xff]   ;;  %v2560_v61 = vld [vmem:[%s3565_s3 + $0x148] sm:$0xff]   ;;  %s3593_s17 = smov (!%p3053_p1, %s411_s17), 17 }
  0x20   : > { %2129 = vmatpush3.bf16.msra.mxu0 %v2536_v10  ;;  %s2444_s19 = smul.u32 3, %s384_s18  ;;  %v2553_v27 = vld [vmem:[%s3565_s3 + $0xb0] sm:$0xff]   ;;  %v2557_v31 = vld [vmem:[%s3565_s3 + $0xb8] sm:$0xff]  }
  0x21   : > { %2193 = vmatpush3.bf16.msra.mxu1 %v2537_v11  ;;  %2130 = vmatprep.subr.bf16.mxu0 %v2538_v12  ;;  %v2561_v11 = vld [vmem:[%s3565_s3 + $0x108] sm:$0xff]   ;;  %s3083_s29 = scalar_select %p400_p0, %s3028_s27, 17 }
  0x22   : > { %2194 = vmatprep.subr.bf16.mxu1 %v2539_v13  ;;  %s387_s18 = sadd.s32 %s2900_s8, %s2444_s19  ;;  %v2563_v13 = vld [vmem:[%s3565_s3 + $0x1c0] sm:$0xff]  }
  0x23   : > { %s2023_s12 = sshll.u32 %s387_s18, 3  ;;  %s2446_s16 = smul.u32 3, %s3083_s29 }
  0x24   : > { %2131 = vmatpush3.bf16.msra.mxu0 %v2540_v14  ;;  %s2939_s30 = scalar_lea.vmem %s3562_s0, %s2023_s12  ;;  %s2447_s12 = smul.u32 3, %s3593_s17 }
  0x25   : > { %2195 = vmatpush3.bf16.msra.mxu1 %v2541_v15  ;;  %2132 = vmatprep.subr.bf16.mxu0 %v2542_v16  ;;  %v426_v32 = vld [vmem:[%s2939_s30] sm:$0xff]  ;;  %v427_v33 = vld [vmem:[%s2939_s30 + $0x8] sm:$0xff]  ;;  %v428_v34 = vld [vmem:[%s2939_s30 + $0x10] sm:$0x3]  ;;  %s404_s27 = sadd.s32 %s2446_s16, %s2900_s8  ;;  %s2105_s17 = sshll.u32 %s2712_s25, 5 }
  0x26   : > { %2196 = vmatprep.subr.bf16.mxu1 %v2543_v17  ;;  %v456_v35 = vpack.c.bf16 %v427_v33, %v426_v32  ;;  %v457_v36 = vpack.c.bf16 %v428_v34, %v428_v34  ;;  %v429_v37 = vld [vmem:[%s2939_s30 + $0x18] sm:$0xff]  ;;  %v430_v38 = vld [vmem:[%s2939_s30 + $0x20] sm:$0xff]  ;;  %v431_v46 = vld [vmem:[%s2939_s30 + $0x28] sm:$0x3]  ;;  %s418_s18 = sadd.s32 %s2447_s12, %s2900_s8  ;;  %s2025_s8 = sshll.u32 %s404_s27, 3 }
  0x27   : > { %v2952_v39 = vpack.c.bf16 %v430_v38, %v429_v37  ;;  %v459_v51 = vpack.c.bf16 %v431_v46, %v431_v46  ;;  %v432_v52 = vld [vmem:[%s2939_s30 + $0x30] sm:$0xff]  ;;  %v433_v53 = vld [vmem:[%s2939_s30 + $0x38] sm:$0xff]  ;;  %v434_v0 = vld [vmem:[%s2939_s30 + $0x40] sm:$0x3]  ;;  %s3193_s27 = scalar_lea.vmem %s3563_s1, %s2025_s8  ;;  %s3386_s8 = sand.u32 1, %s2700_s22  }
  0x28   : > { %2133 = vmatpush3.bf16.msra.mxu0 %v2544_v18  ;;  %v478_v41 = vshrl.u32 %v456_v35, 16  ;;  %v480_v42 = vshll.u32 %v456_v35, 16  ;;  %v485_v43 = vshll.u32 %v457_v36, 16  ;;  %v598_v44 = vrot.slane %v456_v35, 1  ;;  %v435_v2 = vld [vmem:[%s2939_s30 + $0x48] sm:$0xff]  ;;  %v436_v3 = vld [vmem:[%s2939_s30 + $0x50] sm:$0xff] }
  0x29   : > { %2197 = vmatpush3.bf16.msra.mxu1 %v2545_v19  ;;  %2134 = vmatprep.subr.bf16.mxu0 %v2546_v20  ;;  %v599_v45 = vrot.slane %v457_v36, 1  ;;  %v490_v47 = vshrl.u32 %v2952_v39, 16  ;;  %v492_v48 = vshll.u32 %v2952_v39, 16  ;;  %v2967_v57 = vpack.c.bf16 %v433_v53, %v432_v52  ;;  %v2562_v17 = vld [vmem:[%s3565_s3 + $0x150] sm:$0xff]   ;;  %v2565_v18 = vld [vmem:[%s3565_s3 + $0x180] sm:$0xff]   ;;  %v2567_v32 = vld [vmem:[%s3565_s3 + $0x1c8] sm:$0xff]  }
  0x2a   : > { %2198 = vmatprep.subr.bf16.mxu1 %v2547_v21  ;;  %1380 = vmatprep.mubr.bf16.mxu1 %v2952_v39  ;;  %v482_v49 = vrot.slane %v480_v42, 1  ;;  %v487_v50 = vrot.slane %v485_v43, 1  ;;  %v601_v58 = vrot.slane %v2952_v39, 1  ;;  %v497_v60 = vshll.u32 %v459_v51, 16  ;;  %v437_v19 = vld [vmem:[%s2939_s30 + $0x58] sm:$0x3] }
  0x2b   : > { %v600_v54 = vsel %vm597_vm0, %v598_v44, %v599_v45  ;;  %v494_v56 = vrot.slane %v492_v48, 1  ;;  %v602_v63 = vrot.slane %v459_v51, 1  ;;  %v504_v1 = vshll.u32 %v2967_v57, 16  ;;  %v2569_v34 = vld [vmem:[%s3565_s3 + $0x188] sm:$0xff]   ;;  %v2568_v36 = vld [vmem:[%s3565_s3 + $0x118] sm:$0xff]   ;;  %v2570_v44 = vld [vmem:[%s3565_s3 + $0x160] sm:$0xff]  }
  0x2c   : > { %2135 = vmatpush3.bf16.msra.mxu0 %v2548_v22  ;;  %v483_v59 = vor.u32 %v482_v49, %v478_v41  ;;  %v499_v5 = vrot.slane %v497_v60, 1  ;;  %v461_v6 = vpack.c.bf16 %v434_v0, %v434_v0  ;;  %v502_v7 = vshrl.u32 %v2967_v57, 16  ;;  %v441_v38 = vld [vmem:[%s2939_s30 + $0x78] sm:$0xff]  ;;  %v2571_v45 = vld [vmem:[%s3565_s3 + $0x1d0] sm:$0xff]   ;;  %v2572_v52 = vld [vmem:[%s3565_s3 + $0x120] sm:$0xff]   ;;  %s2123_s12 = sshll.u32 %s2708_s24, 4 }
  0x2d   : > { %2199 = vmatpush3.bf16.msra.mxu1 %v2549_v23  ;;  %2136 = vmatprep.subr.bf16.mxu0 %v2550_v24  ;;  %v495_v62 = vor.u32 %v494_v56, %v490_v47  ;;  %v506_v8 = vrot.slane %v504_v1, 1  ;;  %v2980_v9 = vpack.c.bf16 %v436_v3, %v435_v2  ;;  %v2993_v14 = vsel %vm597_vm0, %v601_v58, %v602_v63  ;;  %v438_v24 = vld [vmem:[%s2939_s30 + $0x60] sm:$0xff]  ;;  %v2573_v47 = vld [vmem:[%s3565_s3 + $0x190] sm:$0xff]   ;;  %v443_v53 = vld [vmem:[%s2939_s30 + $0x88] sm:$0x3]  ;;  %s3420_s20 = sadd.s32 %s2123_s12, %s2105_s17  ;;  %s1814_s9 = scalar_lea.sflag [#allocation3], %s3386_s8 }
  0x2e   : > { %2200 = vmatprep.subr.bf16.mxu1 %v2551_v25  ;;  %v488_v4 = vsel %vm476_vm1, %v483_v59, %v487_v50  ;;  %v509_v12 = vshll.u32 %v461_v6, 16  ;;  %v604_v21 = vrot.slane %v2967_v57, 1  ;;  %v605_v22 = vrot.slane %v461_v6, 1  ;;  %v439_v25 = vld [vmem:[%s2939_s30 + $0x68] sm:$0xff]  ;;  %v2575_v58 = vld [vmem:[%s3565_s3 + $0x1d8] sm:$0xff]   ;;  %v444_v3 = vld [vmem:[%s2939_s30 + $0x90] sm:$0xff] }
  0x2f   : > { %1283 = vmatprep.mubr.bf16.mxu0 %v488_v4  ;;  %v2983_v10 = vsel %vm476_vm1, %v495_v62, %v499_v5  ;;  %v507_v15 = vor.u32 %v506_v8, %v502_v7  ;;  %v516_v20 = vshll.u32 %v2980_v9, 16  ;;  %v463_v23 = vpack.c.bf16 %v437_v19, %v437_v19  ;;  %v2574_v56 = vld [vmem:[%s3565_s3 + $0x168] sm:$0xff]   ;;  %v445_v4 = vld [vmem:[%s2939_s30 + $0x98] sm:$0xff]  ;;  %v446_v6 = vld [vmem:[%s2939_s30 + $0xa0] sm:$0x3]  ;;  %s2106_s14 = sshll.u32 %s3420_s20, 7 }
  0x30   : > { %2137 = vmatpush3.bf16.msra.mxu0 %v2552_v26  ;;  %v511_v16 = vrot.slane %v509_v12, 1  ;;  %v2564_v26 = vld [vmem:[%s3565_s3 + $0x110] sm:$0xff]   ;;  %v3040_v41 = vsel %vm597_vm0, %v604_v21, %v605_v22  ;;  %v607_v46 = vrot.slane %v2980_v9, 1  ;;  %v3096_v60 = vpack.c.bf16 %v443_v53, %v443_v53  ;;  %v2576_v62 = vld [vmem:[%s3565_s3 + $0x128] sm:$0xff]   ;;  %v2577_v5 = vld [vmem:[%s3565_s3 + $0x198] sm:$0xff]  }
  0x31   : > { %2201 = vmatpush3.bf16.msra.mxu1 %v2553_v27  ;;  %2138 = vmatprep.subr.bf16.mxu0 %v2554_v28  ;;  %v514_v27 = vshrl.u32 %v2980_v9, 16  ;;  %v3011_v28 = vpack.c.bf16 %v439_v25, %v438_v24  ;;  %v608_v48 = vrot.slane %v463_v23, 1  ;;  %v2578_v8 = vld [vmem:[%s3565_s3 + $0x170] sm:$0xff]   ;;  %v3132_v19 = vpack.c.bf16 %v446_v6, %v446_v6  ;;  %v447_v24 = vld [vmem:[%s2939_s30 + $0xa8] sm:$0xff] }
  0x32   : > { %2202 = vmatprep.subr.bf16.mxu1 %v2555_v29  ;;  %v518_v29 = vrot.slane %v516_v20, 1  ;;  %v3021_v33 = vsel %vm476_vm1, %v507_v15, %v511_v16  ;;  %v545_v12 = vshll.u32 %v3096_v60, 16  ;;  %v2580_v15 = vld [vmem:[%s3565_s3 + $0x130] sm:$0xff]   ;;  %v2582_v20 = vld [vmem:[%s3565_s3 + $0x1e8] sm:$0xff]  }
  0x33   : > { %v528_v37 = vshll.u32 %v3011_v28, 16  ;;  %v526_v49 = vshrl.u32 %v3011_v28, 16  ;;  %v3094_v59 = vsel %vm597_vm0, %v607_v46, %v608_v48  ;;  %v610_v1 = vrot.slane %v3011_v28, 1  ;;  %v448_v25 = vld [vmem:[%s2939_s30 + $0xb0] sm:$0xff]  ;;  %v2590_v46 = vld [vmem:[%s3565_s3 + $0x200] sm:$0xff]  }
  0x34   : > { %2139 = vmatpush3.bf16.msra.mxu0 %v2556_v30  ;;  %v521_v30 = vshll.u32 %v463_v23, 16  ;;  %v519_v42 = vor.u32 %v518_v29, %v514_v27  ;;  %v547_v22 = vrot.slane %v545_v12, 1  ;;  %v2583_v29 = vld [vmem:[%s3565_s3 + $0x1a8] sm:$0xff]   ;;  %v617_v53 = vrot.slane %v3132_v19, 1 }
  0x35   : > { %2203 = vmatpush3.bf16.msra.mxu1 %v2557_v31  ;;  %2252 = vmatprep.subr.bf16.mxu0 %v2558_v40  ;;  %v2566_v31 = vld [vmem:[%s3565_s3 + $0x158] sm:$0xff]   ;;  %v442_v40 = vld [vmem:[%s2939_s30 + $0x80] sm:$0xff]  ;;  %v530_v50 = vrot.slane %v528_v37, 1 }
  0x36   : > { %2316 = vmatprep.subr.bf16.mxu1 %v2563_v13  ;;  %v523_v43 = vrot.slane %v521_v30, 1  ;;  %v3064_v51 = vpack.c.bf16 %v442_v40, %v441_v38  ;;  %v2579_v13 = vld [vmem:[%s3565_s3 + $0x1e0] sm:$0xff]   ;;  %v614_v30 = vrot.slane %v3096_v60, 1  ;;  %v449_v37 = vld [vmem:[%s2939_s30 + $0xb8] sm:$0x3] }
  0x37   : > { %1284 = vmatmul.mubr.bf16.vlgmr.msra.gmra.mrb[0].mxu0 %v456_v35  ;;  %v440_v35 = vld [vmem:[%s2939_s30 + $0x70] sm:$0x3]  ;;  %v531_v63 = vor.u32 %v530_v50, %v526_v49  ;;  %s2027_s30 = sshll.u32 %s418_s18, 3  ;;  %v471_v48 = vpack.c.bf16 %v449_v37, %v449_v37  ;;  %v2589_v50 = vld [vmem:[%s3565_s3 + $0x1b8] sm:$0xff]  }
  0x38   : > { %1381 = vmatmul.mubr.bf16.vlgmr.msra.gmra.mrb[0].mxu1 %v600_v54  ;;  %2253 = vmatpush3.bf16.msra.mxu0 %v2559_v55  ;;  %v3071_v54 = vsel %vm476_vm1, %v519_v42, %v523_v43  ;;  %v538_v7 = vshrl.u32 %v3064_v51, 16  ;;  %v613_v23 = vrot.slane %v3064_v51, 1  ;;  %v3170_v42 = vpack.c.bf16 %v448_v25, %v447_v24  ;;  %v2587_v43 = vld [vmem:[%s3565_s3 + $0x1b0] sm:$0xff]   ;;  %s420_s19 = scalar_lea.vmem %s3564_s2, %s2027_s30  ;;  %s2020_s30 = sshll.u32 %s3386_s8, 7 }
  0x39   : > { %1388 = vmatprep.mubr.bf16.mxu1 %v2967_v57  ;;  %1291 = vmatprep.mubr.bf16.mxu0 %v2983_v10  ;;  %v569_v60 = vshll.u32 %v471_v48, 16  ;;  %s3395_s16 = scalar_lea.vmem [#allocation2], %s2020_s30  ;;  %s2602_s30 = sshll.u32 %s2726_s7, 4  ;;  %s2603_s30 = int_to_ptr.vmem [resolvable:$false] %s2602_s30 }
  0x3a   : > { %2254 = vmatprep.subr.bf16.mxu0 %v2560_v61  ;;  %2317 = vmatpush3.bf16.msra.mxu1 %v2565_v18  ;;  %v540_v61 = vshll.u32 %v3064_v51, 16  ;;  %v2581_v18 = vld [vmem:[%s3565_s3 + $0x1a0] sm:$0xff]   ;;  %v564_v49 = vshll.u32 %v3170_v42, 16  ;;  %s1835_s13 = sshll.u32 %s3395_s16, 4  ;;  %s2604_s12 = scalar_lea.vmem %s2603_s30, 4096  ;;  %s3448_s13 = int_to_ptr.vmem [resolvable:$true] %s1835_s13 }
  0x3b   : > { %2318 = vmatprep.subr.bf16.mxu1 %v2567_v32  ;;  %p2605_p6 = scmp.lt.s32.totalorder %s3448_s13, %s2603_s30 }
  0x3c   : > { %2255 = vmatpush3.bf16.msra.mxu0 %v2561_v11  ;;  %v542_v11 = vrot.slane %v540_v61, 1  ;;  %v450_v61 = vld [vmem:[%s3193_s27] sm:$0xff] }
  0x3d   : > { %2256 = vmatprep.subr.bf16.mxu0 %v2562_v17  ;;  %v3126_v17 = vpack.c.bf16 %v445_v4, %v444_v3 }
  0x3e   : > { %2319 = vmatpush3.bf16.msra.mxu1 %v2569_v34  ;;  %v557_v34 = vshll.u32 %v3132_v19, 16  ;;  %v620_v19 = vrot.slane %v471_v48, 1 }
  0x3f   : > { %1292 = vmatmul.mubr.bf16.gmra.mrb[4].mxu0 %v2952_v39  ;;  %v3042_v39 = vpack.c.bf16 %v440_v35, %v440_v35  ;;  %2320 = vmatprep.subr.bf16.mxu1 %v2571_v45  ;;  %v552_v27 = vshll.u32 %v3126_v17, 16  ;;  %v550_v32 = vshrl.u32 %v3126_v17, 16  ;;  %v2585_v35 = vld [vmem:[%s3565_s3 + $0x1f0] sm:$0xff]  }
  0x40   : > { %1389 = vmatmul.mubr.bf16.gmra.mrb[4].mxu1 %v2993_v14  ;;  %1299 = vmatprep.mubr.bf16.mxu0 %v3021_v33  ;;  %v559_v45 = vrot.slane %v557_v34, 1 }
  0x41   : > { %1396 = vmatprep.mubr.bf16.mxu1 %v2980_v9  ;;  %2257 = vmatpush3.bf16.msra.mxu0 %v2564_v26  ;;  %v533_v55 = vshll.u32 %v3042_v39, 16  ;;  %v611_v2 = vrot.slane %v3042_v39, 1  ;;  %v543_v26 = vor.u32 %v542_v11, %v538_v7  ;;  %v554_v40 = vrot.slane %v552_v27, 1  ;;  %v2588_v39 = vld [vmem:[%s3565_s3 + $0x1f8] sm:$0xff]  }
  0x42   : > { %2258 = vmatprep.subr.bf16.mxu0 %v2566_v31  ;;  %2321 = vmatpush3.bf16.msra.mxu1 %v2573_v47  ;;  %v2584_v31 = vld [vmem:[%s3565_s3 + $0x178] sm:$0xff]   ;;  %v571_v7 = vrot.slane %v569_v60, 1 }
  0x43   : > { %v535_v0 = vrot.slane %v533_v55, 1  ;;  %2322 = vmatprep.subr.bf16.mxu1 %v2575_v58  ;;  %v3140_v21 = vsel %vm597_vm0, %v610_v1, %v611_v2  ;;  %v3168_v38 = vsel %vm476_vm1, %v543_v26, %v547_v22  ;;  %v555_v47 = vor.u32 %v554_v40, %v550_v32  ;;  %v455_v1 = vld [vmem:[%s420_s19 + $0x10] sm:$0x3] }
  0x44   : > { %v562_v55 = vshrl.u32 %v3170_v42, 16  ;;  %v566_v58 = vrot.slane %v564_v49, 1 }
  0x45   : > { %2259 = vmatpush3.bf16.msra.mxu0 %v2568_v36  ;;  %v3124_v16 = vsel %vm476_vm1, %v531_v63, %v535_v0  ;;  %v2586_v36 = vld [vmem:[%s3565_s3 + $0x138] sm:$0xff]   ;;  %v453_v63 = vld [vmem:[%s420_s19] sm:$0xff]  ;;  %v454_v0 = vld [vmem:[%s420_s19 + $0x8] sm:$0xff]  ;;  %s3446_s19 = scalar_lea.hbm %s3567_s5, %s2106_s14 }
  0x46   : > { %2260 = vmatprep.subr.bf16.mxu0 %v2570_v44  ;;  %2323 = vmatpush3.bf16.msra.mxu1 %v2577_v5  ;;  %v3181_v44 = vsel %vm597_vm0, %v613_v23, %v614_v30  ;;  %v3215_v4 = vpack.c.bf16 %v454_v0, %v453_v63  ;;  %v475_v5 = vpack.c.bf16 %v455_v1, %v455_v1  ;;  %v2592_v30 = vld [vmem:[%s3565_s3 + $0x210] sm:$0xff]  }
  0x47   : > { %1300 = vmatmul.mubr.bf16.gmra.mrb[8].mxu0 %v2967_v57  ;;  %2324 = vmatprep.subr.bf16.mxu1 %v2579_v13  ;;  %v567_v6 = vor.u32 %v566_v58, %v562_v55 }
  0x48   : > { %1397 = vmatmul.mubr.bf16.gmra.mrb[8].mxu1 %v3040_v41  ;;  %1307 = vmatprep.mubr.bf16.mxu0 %v3071_v54  ;;  %v652_v11 = vshll.u32 %v3215_v4, 16  ;;  %v657_v12 = vshll.u32 %v475_v5, 16  ;;  %v664_v13 = vrot.slane %v3215_v4, 1 }
  0x49   : > { %1404 = vmatprep.mubr.bf16.mxu1 %v3011_v28  ;;  %2261 = vmatpush3.bf16.msra.mxu0 %v2572_v52  ;;  %v616_v52 = vrot.slane %v3126_v17, 1  ;;  %v3224_v22 = vsel %vm476_vm1, %v567_v6, %v571_v7 }
  0x4a   : > { %2262 = vmatprep.subr.bf16.mxu0 %v2574_v56  ;;  %2325 = vmatpush3.bf16.msra.mxu1 %v2581_v18  ;;  %v3204_v56 = vsel %vm476_vm1, %v555_v47, %v559_v45  ;;  %v619_v18 = vrot.slane %v3170_v42, 1  ;;  %v659_v23 = vrot.slane %v657_v12, 1 }
  0x4b   : > { %2326 = vmatprep.subr.bf16.mxu1 %v2582_v20  ;;  %v3211_v2 = vsel %vm597_vm0, %v616_v52, %v617_v53  ;;  %v654_v20 = vrot.slane %v652_v11, 1 }
  0x4c   : > { %v3232_v26 = vsel %vm597_vm0, %v619_v18, %v620_v19 }
  0x4d   : > { %2263 = vmatpush3.bf16.msra.mxu0 %v2576_v62  ;;  %v451_v62 = vld [vmem:[%s3193_s27 + $0x8] sm:$0xff] }
  0x4e   : > { %2264 = vmatprep.subr.bf16.mxu0 %v2578_v8  ;;  %2327 = vmatpush3.bf16.msra.mxu1 %v2583_v29  ;;  %v3213_v3 = vpack.c.bf16 %v451_v62, %v450_v61  ;;  %v650_v8 = vshrl.u32 %v3215_v4, 16  ;;  %v2591_v29 = vld [vmem:[%s3565_s3 + $0x208] sm:$0xff]  }
  0x4f   : > { %1308 = vmatmul.mubr.bf16.gmra.mrb[12].mxu0 %v2980_v9  ;;  %2328 = vmatprep.subr.bf16.mxu1 %v2585_v35 }
  0x50   : > { %1405 = vmatmul.mubr.bf16.gmra.mrb[12].mxu1 %v3094_v59  ;;  %1315 = vmatprep.mubr.bf16.mxu0 %v3124_v16  ;;  %v655_v25 = vor.u32 %v654_v20, %v650_v8  ;;  %v633_v32 = vshll.u32 %v3213_v3, 16 }
  0x51   : > { %1412 = vmatprep.mubr.bf16.mxu1 %v3064_v51  ;;  %2265 = vmatpush3.bf16.msra.mxu0 %v2580_v15  ;;  %v665_v15 = vrot.slane %v475_v5, 1 }
  0x52   : > { %2266 = vmatprep.subr.bf16.mxu0 %v2584_v31  ;;  %2329 = vmatpush3.bf16.msra.mxu1 %v2587_v43  ;;  %v3235_v27 = vsel %vm476_vm1, %v655_v25, %v659_v23  ;;  %v635_v34 = vrot.slane %v633_v32, 1 }
  0x53   : > { %2330 = vmatprep.subr.bf16.mxu1 %v2588_v39  ;;  %v3227_v24 = vsel %vm597_vm0, %v664_v13, %v665_v15 }
  0x55   : > { %2267 = vmatpush3.bf16.msra.mxu0 %v2586_v36 }
  0x56   : > { %2396 = vmatprep.subr.bf16.mxu0 %v2590_v46  ;;  %2331 = vmatpush3.bf16.msra.mxu1 %v2589_v50 }
  0x57   : > { %1316 = vmatmul.mubr.bf16.gmra.mrb[16].mxu0 %v3011_v28  ;;  %2428 = vmatprep.subr.bf16.mxu1 %v2590_v46 }
  0x58   : > { %1413 = vmatmul.mubr.bf16.gmra.mrb[16].mxu1 %v3140_v21  ;;  %1323 = vmatprep.mubr.bf16.mxu0 %v3168_v38 }
  0x59   : > { %1420 = vmatprep.mubr.bf16.mxu1 %v3126_v17 }
  0x5f   : > { %1324 = vmatmul.mubr.bf16.gmra.mrb[20].mxu0 %v3064_v51 }
  0x60   : > { %1421 = vmatmul.mubr.bf16.gmra.mrb[20].mxu1 %v3181_v44  ;;  %1331 = vmatprep.mubr.bf16.mxu0 %v3204_v56 }
  0x61   : > { %1428 = vmatprep.mubr.bf16.mxu1 %v3170_v42 }
  0x67   : > { %1332 = vmatmul.mubr.bf16.gmra.mrb[24].mxu0 %v3126_v17 }
  0x68   : > { %1429 = vmatmul.mubr.bf16.gmra.mrb[24].mxu1 %v3211_v2  ;;  %1339 = vmatprep.mubr.bf16.mxu0 %v3224_v22 }
  0x69   : > { %1436 = vmatprep.mubr.bf16.mxu1 %v3213_v3 }
  0x6f   : > { %1340 = vmatmul.mubr.bf16.gmra.mrb[28].mxu0 %v3170_v42 }
  0x70   : > { %1437 = vmatmul.mubr.bf16.gmra.mrb[28].mxu1 %v3232_v26  ;;  %1477 = vmatprep.mubr.bf16.mxu0 %v2993_v14  ;;  %v2593_v14 = vld [vmem:[%s3565_s3 + $0x218] sm:$0xff]  }
  0x71   : > { %1574 = vmatprep.mubr.bf16.mxu1 %v3021_v33 }
  0x77   : > { %1478 = vmatmul.mubr.bf16.vlgmr.msra.gmra.mrb[32].mxu0 %v2983_v10  ;;  %v2596_v10 = vld [vmem:[%s3565_s3 + $0x230] sm:$0xff]  }
  0x78   : > { %1575 = vmatmul.mubr.bf16.vlgmr.msra.gmra.mrb[32].mxu1 %v2967_v57  ;;  %2397 = vmatpush3.bf16.msra.mxu0 %v2590_v46  ;;  %v2594_v57 = vld [vmem:[%s3565_s3 + $0x220] sm:$0xff]  }
  0x79   : > { %1582 = vmatprep.mubr.bf16.mxu1 %v3071_v54  ;;  %2436 = vmatpush3.bf16.msra.mxu1 %v2590_v46 }
  0x7a   : > { %2429 = vmatprep.subr.bf16.mxu1 %v2591_v29  ;;  %1485 = vmatprep.mubr.bf16.mxu0 %v3040_v41 }
  0x7b   : > { %2398 = vmatprep.subr.bf16.mxu0 %v2591_v29 }
  0x7c   : > { %2399 = vmatpush3.bf16.msra.mxu0 %v2591_v29 }
  0x7d   : > { %2437 = vmatpush3.bf16.msra.mxu1 %v2591_v29  ;;  %2400 = vmatprep.subr.bf16.mxu0 %v2592_v30 }
  0x7e   : > { %2430 = vmatprep.subr.bf16.mxu1 %v2592_v30 }
  0x7f   : > { %1486 = vmatmul.mubr.bf16.gmra.mrb[36].mxu0 %v3021_v33  ;;  %v452_v33 = vld [vmem:[%s3193_s27 + $0x10] sm:$0x3]  ;;  %s2598_s27 = scalar_lea.vmem %s3448_s13, 2048 }
  0x80   : > { %1583 = vmatmul.mubr.bf16.gmra.mrb[36].mxu1 %v2980_v9  ;;  %1493 = vmatprep.mubr.bf16.mxu0 %v3094_v59  ;;  %v2595_v9 = vld [vmem:[%s3565_s3 + $0x228] sm:$0xff]   ;;  %v473_v31 = vpack.c.bf16 %v452_v33, %v452_v33  ;;  %p2599_p2 = scmp.ne.s32.totalorder %s3448_s13, %s2598_s27  ;;  %p2606_p7 = scmp.lt.s32.totalorder %s2604_s12, %s2598_s27 }
  0x81   : > { %1590 = vmatprep.mubr.bf16.mxu1 %v3124_v16  ;;  %2438 = vmatpush3.bf16.msra.mxu1 %v2592_v30 }
  0x82   : > { %2431 = vmatprep.subr.bf16.mxu1 %v2593_v14  ;;  %2401 = vmatpush3.bf16.msra.mxu0 %v2592_v30  ;;  %v638_v35 = vshll.u32 %v473_v31, 16  ;;  %v646_v37 = vrot.slane %v473_v31, 1  ;;  %p2600_p4 = pnand %p2599_p2, %p2816_p3  ;;  %p2607_p9 = por %p2606_p7, %p2605_p6 }
  0x83   : > { %2402 = vmatprep.subr.bf16.mxu0 %v2593_v14 }
  0x84   : > { %v640_v36 = vrot.slane %v638_v35, 1  ;;  %p2601_p5 = pneg %p2600_p4 }
  0x85   : > { %2439 = vmatpush3.bf16.msra.mxu1 %v2593_v14 }
  0x86   : > { %2432 = vmatprep.subr.bf16.mxu1 %v2594_v57  ;;  %2403 = vmatpush3.bf16.msra.mxu0 %v2593_v14  ;;  %p2608_p10 = pnand %p2607_p9, %p2601_p5 }
  0x87   : > { %2404 = vmatprep.subr.bf16.mxu0 %v2594_v57  ;;  %1494 = vmatmul.mubr.bf16.gmra.mrb[40].mxu0 %v3071_v54  ;;  %v631_v54 = vshrl.u32 %v3213_v3, 16 }
  0x88   : > { %1591 = vmatmul.mubr.bf16.gmra.mrb[40].mxu1 %v3011_v28  ;;  %1501 = vmatprep.mubr.bf16.mxu0 %v3140_v21  ;;  %v2597_v28 = vld [vmem:[%s3565_s3 + $0x238] sm:$0xff]  }
  0x89   : > { %1598 = vmatprep.mubr.bf16.mxu1 %v3168_v38  ;;  %2440 = vmatpush3.bf16.msra.mxu1 %v2594_v57 }
  0x8a   : > { %2433 = vmatprep.subr.bf16.mxu1 %v2595_v9  ;;  %2405 = vmatpush3.bf16.msra.mxu0 %v2594_v57 }
  0x8b   : > { %2406 = vmatprep.subr.bf16.mxu0 %v2595_v9 }
  0x8d   : > { %2441 = vmatpush3.bf16.msra.mxu1 %v2595_v9 }
  0x8e   : > { %2434 = vmatprep.subr.bf16.mxu1 %v2596_v10  ;;  %2407 = vmatpush3.bf16.msra.mxu0 %v2595_v9 }
  0x8f   : > { %2408 = vmatprep.subr.bf16.mxu0 %v2596_v10  ;;  %1502 = vmatmul.mubr.bf16.gmra.mrb[44].mxu0 %v3124_v16 }
  0x90   : > { %1599 = vmatmul.mubr.bf16.gmra.mrb[44].mxu1 %v3064_v51  ;;  %1509 = vmatprep.mubr.bf16.mxu0 %v3181_v44  ;;  %v636_v51 = vor.u32 %v635_v34, %v631_v54 }
  0x91   : > { %1606 = vmatprep.mubr.bf16.mxu1 %v3204_v56  ;;  %2442 = vmatpush3.bf16.msra.mxu1 %v2596_v10 }
  0x92   : > { %2435 = vmatprep.subr.bf16.mxu1 %v2597_v28  ;;  %2409 = vmatpush3.bf16.msra.mxu0 %v2596_v10  ;;  %v641_v16 = vsel %vm476_vm1, %v636_v51, %v640_v36 }
  0x93   : > { %2410 = vmatprep.subr.bf16.mxu0 %v2597_v28 }
  0x95   : > { %2443 = vmatpush3.bf16.msra.mxu1 %v2597_v28 }
  0x96   : > { %2411 = vmatpush3.bf16.msra.mxu0 %v2597_v28 }
  0x97   : > { %1510 = vmatmul.mubr.bf16.gmra.mrb[48].mxu0 %v3168_v38 }
  0x98   : > { %1607 = vmatmul.mubr.bf16.gmra.mrb[48].mxu1 %v3126_v17  ;;  %1517 = vmatprep.mubr.bf16.mxu0 %v3211_v2  ;;  %v645_v17 = vrot.slane %v3213_v3, 1 }
  0x99   : > { %1614 = vmatprep.mubr.bf16.mxu1 %v3224_v22 }
  0x9a   : > { %v647_v38 = vsel %vm597_vm0, %v645_v17, %v646_v37 }
  0x9f   : > { %1518 = vmatmul.mubr.bf16.gmra.mrb[52].mxu0 %v3204_v56 }
  0xa0   : > { %1615 = vmatmul.mubr.bf16.gmra.mrb[52].mxu1 %v3170_v42  ;;  %1525 = vmatprep.mubr.bf16.mxu0 %v3232_v26 }
  0xa1   : > { %1622 = vmatprep.mubr.bf16.mxu1 %v641_v16 }
  0xa7   : > { %1526 = vmatmul.mubr.bf16.gmra.mrb[56].mxu0 %v3224_v22 }
  0xa8   : > { %1623 = vmatmul.mubr.bf16.gmra.mrb[56].mxu1 %v3213_v3  ;;  %1533 = vmatprep.mubr.bf16.mxu0 %v647_v38 }
  0xa9   : > { %1630 = vmatprep.mubr.bf16.mxu1 %v3235_v27 }
  0xaf   : > { %1534 = vmatmul.mubr.bf16.gmra.mrb[60].mxu0 %v641_v16 }
  0xb0   : > { %1631 = vmatmul.mubr.bf16.gmra.mrb[60].mxu1 %v3215_v4  ;;  %2412 = vmatprep.mubr.bf16.mxu0 %v3040_v41  ;;  %v3305_v41 = vld [vmem:[%s3566_s4] ss:$0 sm:$0xff] }
  0xb1   : > { %2420 = vmatprep.mubr.bf16.mxu1 %v3211_v2 }
  0xb7   : > { %2413 = vmatmul.mubr.bf16.vlgmr.msra.gmra.mrb[64].mxu0 %v3094_v59 }
  0xb8   : > { %2421 = vmatmul.mubr.bf16.vlgmr.msra.gmra.mrb[64].mxu1 %v3232_v26  ;;  %2416 = vmatprep.mubr.bf16.mxu0 %v3140_v21 }
  0xb9   : > { %2424 = vmatprep.mubr.bf16.mxu1 %v647_v38 }
  0xbf   : > { %2417 = vmatmul.mubr.bf16.gmra.mrb[68].mxu0 %v3181_v44 }
  0xc0   : > { %2425 = vmatmul.mubr.bf16.gmra.mrb[68].mxu1 %v3227_v24 }
 0x10a   : > { %v2140_v46 = vpop.f32.mrb[0].mxu0 }
 0x10b   : > { %v2204_v40 = vpop.f32.mrb[0].mxu1  ;;  %v2141_v48 = vpop.f32.mrb[1].mxu0 }
 0x10c   : > { %v2205_v42 = vpop.f32.mrb[1].mxu1  ;;  %v2142_v59 = vadd.f32 %v2141_v48, %v2140_v46  ;;  %v2143_v49 = vpop.f32.mrb[2].mxu0 }
 0x10d   : > { %v2206_v43 = vadd.f32 %v2205_v42, %v2204_v40  ;;  %v2207_v39 = vpop.f32.mrb[2].mxu1  ;;  %v2144_v21 = vpop.f32.mrb[3].mxu0 }
 0x10e   : > { %v2208_v45 = vpop.f32.mrb[3].mxu1  ;;  %v1286_v50 = vadd.f32 %v2142_v59, %v3305_v41  ;;  %v2145_v52 = vadd.f32 %v2144_v21, %v2143_v49 }
 0x10f   : > { %v2209_v47 = vadd.f32 %v2208_v45, %v2207_v39 }
 0x110   : > { %v1289_v55 = vadd.f32 %v2145_v52, %v3305_v41  ;;  %v3309_v56 = vadd.f32 %v2206_v43, %v1286_v50 }
 0x112   : > { %v3311_v62 = vadd.f32 %v2209_v47, %v1289_v55  ;;  %v2146_v63 = vpop.f32.mrb[4].mxu0 }
 0x113   : > { %v2210_v44 = vpop.f32.mrb[4].mxu1  ;;  %v2147_v1 = vpop.f32.mrb[5].mxu0 }
 0x114   : > { %v2211_v53 = vpop.f32.mrb[5].mxu1  ;;  %v2148_v2 = vadd.f32 %v2147_v1, %v2146_v63  ;;  %v2149_v3 = vpop.f32.mrb[6].mxu0 }
 0x115   : > { %v2212_v58 = vadd.f32 %v2211_v53, %v2210_v44  ;;  %v2213_v60 = vpop.f32.mrb[6].mxu1  ;;  %v2150_v4 = vpop.f32.mrb[7].mxu0 }
 0x116   : > { %v2214_v61 = vpop.f32.mrb[7].mxu1  ;;  %v1294_v5 = vadd.f32 %v2148_v2, %v3305_v41  ;;  %v2151_v6 = vadd.f32 %v2150_v4, %v2149_v3 }
 0x117   : > { %v2215_v0 = vadd.f32 %v2214_v61, %v2213_v60 }
 0x118   : > { %v1297_v11 = vadd.f32 %v2151_v6, %v3305_v41  ;;  %v3315_v12 = vadd.f32 %v2212_v58, %v1294_v5 }
 0x11a   : > { %v3317_v19 = vadd.f32 %v2215_v0, %v1297_v11  ;;  %v2152_v20 = vpop.f32.mrb[8].mxu0 }
 0x11b   : > { %v2216_v7 = vpop.f32.mrb[8].mxu1  ;;  %v2153_v23 = vpop.f32.mrb[9].mxu0 }
 0x11c   : > { %v2217_v8 = vpop.f32.mrb[9].mxu1  ;;  %v2154_v24 = vadd.f32 %v2153_v23, %v2152_v20  ;;  %v2155_v25 = vpop.f32.mrb[10].mxu0 }
 0x11d   : > { %v2218_v13 = vadd.f32 %v2217_v8, %v2216_v7  ;;  %v2219_v15 = vpop.f32.mrb[10].mxu1  ;;  %v2156_v26 = vpop.f32.mrb[11].mxu0 }
 0x11e   : > { %v2220_v18 = vpop.f32.mrb[11].mxu1  ;;  %v1302_v27 = vadd.f32 %v2154_v24, %v3305_v41  ;;  %v2157_v29 = vadd.f32 %v2156_v26, %v2155_v25 }
 0x11f   : > { %v2221_v22 = vadd.f32 %v2220_v18, %v2219_v15 }
 0x120   : > { %v1305_v57 = vadd.f32 %v2157_v29, %v3305_v41  ;;  %v3321_v9 = vadd.f32 %v2218_v13, %v1302_v27 }
 0x122   : > { %v3323_v31 = vadd.f32 %v2221_v22, %v1305_v57  ;;  %v2158_v32 = vpop.f32.mrb[12].mxu0 }
 0x123   : > { %v2222_v30 = vpop.f32.mrb[12].mxu1  ;;  %v2159_v34 = vpop.f32.mrb[13].mxu0 }
 0x124   : > { %v2223_v14 = vpop.f32.mrb[13].mxu1  ;;  %v2160_v35 = vadd.f32 %v2159_v34, %v2158_v32  ;;  %v2161_v51 = vpop.f32.mrb[14].mxu0 }
 0x125   : > { %v2224_v10 = vadd.f32 %v2223_v14, %v2222_v30  ;;  %v2225_v33 = vpop.f32.mrb[14].mxu1  ;;  %v2162_v36 = vpop.f32.mrb[15].mxu0 }
 0x126   : > { %v2226_v28 = vpop.f32.mrb[15].mxu1  ;;  %v1310_v16 = vadd.f32 %v2160_v35, %v3305_v41  ;;  %v2163_v17 = vadd.f32 %v2162_v36, %v2161_v51 }
 0x127   : > { %v2227_v54 = vadd.f32 %v2226_v28, %v2225_v33 }
 0x128   : > { %v1313_v40 = vadd.f32 %v2163_v17, %v3305_v41  ;;  %v3327_v42 = vadd.f32 %v2224_v10, %v1310_v16 }
 0x12a   : > { %v3329_v46 = vadd.f32 %v2227_v54, %v1313_v40  ;;  %v2164_v47 = vpop.f32.mrb[16].mxu0 }
 0x12b   : > { %v2228_v37 = vpop.f32.mrb[16].mxu1  ;;  %v2165_v59 = vpop.f32.mrb[17].mxu0 }
 0x12c   : > { %v2229_v38 = vpop.f32.mrb[17].mxu1  ;;  %v2166_v49 = vadd.f32 %v2165_v59, %v2164_v47  ;;  %v2167_v21 = vpop.f32.mrb[18].mxu0 }
 0x12d   : > { %v2230_v43 = vadd.f32 %v2229_v38, %v2228_v37  ;;  %v2231_v39 = vpop.f32.mrb[18].mxu1  ;;  %v2168_v50 = vpop.f32.mrb[19].mxu0 }
 0x12e   : > { %v2232_v45 = vpop.f32.mrb[19].mxu1  ;;  %v1318_v52 = vadd.f32 %v2166_v49, %v3305_v41  ;;  %v2169_v44 = vadd.f32 %v2168_v50, %v2167_v21 }
 0x12f   : > { %v2233_v48 = vadd.f32 %v2232_v45, %v2231_v39 }
 0x130   : > { %v1321_v58 = vadd.f32 %v2169_v44, %v3305_v41  ;;  %v3333_v60 = vadd.f32 %v2230_v43, %v1318_v52 }
 0x132   : > { %v3335_v1 = vadd.f32 %v2233_v48, %v1321_v58  ;;  %v2170_v2 = vpop.f32.mrb[20].mxu0 }
 0x133   : > { %v2234_v53 = vpop.f32.mrb[20].mxu1  ;;  %v2171_v4 = vpop.f32.mrb[21].mxu0 }
 0x134   : > { %v2235_v55 = vpop.f32.mrb[21].mxu1  ;;  %v2172_v5 = vadd.f32 %v2171_v4, %v2170_v2  ;;  %v2173_v6 = vpop.f32.mrb[22].mxu0 }
 0x135   : > { %v2236_v61 = vadd.f32 %v2235_v55, %v2234_v53  ;;  %v2237_v63 = vpop.f32.mrb[22].mxu1  ;;  %v2174_v7 = vpop.f32.mrb[23].mxu0 }
 0x136   : > { %v2238_v0 = vpop.f32.mrb[23].mxu1  ;;  %v1326_v8 = vadd.f32 %v2172_v5, %v3305_v41  ;;  %v2175_v11 = vadd.f32 %v2174_v7, %v2173_v6 }
 0x137   : > { %v2239_v3 = vadd.f32 %v2238_v0, %v2237_v63 }
 0x138   : > { %v1329_v18 = vadd.f32 %v2175_v11, %v3305_v41  ;;  %v3339_v20 = vadd.f32 %v2236_v61, %v1326_v8 }
 0x13a   : > { %v3341_v25 = vadd.f32 %v2239_v3, %v1329_v18  ;;  %v2176_v26 = vpop.f32.mrb[24].mxu0 }
 0x13b   : > { %v2240_v13 = vpop.f32.mrb[24].mxu1  ;;  %v2177_v29 = vpop.f32.mrb[25].mxu0 }
 0x13c   : > { %v2241_v15 = vpop.f32.mrb[25].mxu1  ;;  %v2178_v30 = vadd.f32 %v2177_v29, %v2176_v26  ;;  %v2179_v14 = vpop.f32.mrb[26].mxu0 }
 0x13d   : > { %v2242_v22 = vadd.f32 %v2241_v15, %v2240_v13  ;;  %v2243_v23 = vpop.f32.mrb[26].mxu1  ;;  %v2180_v57 = vpop.f32.mrb[27].mxu0 }
 0x13e   : > { %v2244_v24 = vpop.f32.mrb[27].mxu1  ;;  %v1334_v10 = vadd.f32 %v2178_v30, %v3305_v41  ;;  %v2181_v33 = vadd.f32 %v2180_v57, %v2179_v14 }
 0x13f   : > { %v2245_v27 = vadd.f32 %v2244_v24, %v2243_v23 }
 0x140   : > { %v1337_v54 = vadd.f32 %v2181_v33, %v3305_v41  ;;  %v3345_v34 = vadd.f32 %v2242_v22, %v1334_v10 }
 0x142   : > { %v3347_v16 = vadd.f32 %v2245_v27, %v1337_v54  ;;  %v2182_v17 = vpop.f32.mrb[28].mxu0 }
 0x143   : > { %v2246_v28 = vpop.f32.mrb[28].mxu1  ;;  %v2183_v38 = vpop.f32.mrb[29].mxu0 }
 0x144   : > { %v2247_v32 = vpop.f32.mrb[29].mxu1  ;;  %v2184_v40 = vadd.f32 %v2183_v38, %v2182_v17  ;;  %v2185_v43 = vpop.f32.mrb[30].mxu0 }
 0x145   : > { %v2248_v35 = vadd.f32 %v2247_v32, %v2246_v28  ;;  %v2249_v51 = vpop.f32.mrb[30].mxu1  ;;  %v2186_v39 = vpop.f32.mrb[31].mxu0 }
 0x146   : > { %v2250_v36 = vpop.f32.mrb[31].mxu1  ;;  %v1342_v45 = vadd.f32 %v2184_v40, %v3305_v41  ;;  %v2187_v47 = vadd.f32 %v2186_v39, %v2185_v43 }
 0x147   : > { %v2251_v37 = vadd.f32 %v2250_v36, %v2249_v51 }
 0x148   : > { %v1345_v49 = vadd.f32 %v2187_v47, %v3305_v41  ;;  %v3351_v21 = vadd.f32 %v2248_v35, %v1342_v45 }
 0x14a   : > { %v3353_v53 = vadd.f32 %v2251_v37, %v1345_v49  ;;  %v2268_v55 = vpop.f32.mrb[32].mxu0 }
 0x14b   : > { %v2332_v48 = vpop.f32.mrb[32].mxu1  ;;  %v2269_v61 = vpop.f32.mrb[33].mxu0 }
 0x14c   : > { %v2333_v59 = vpop.f32.mrb[33].mxu1  ;;  %v2270_v63 = vadd.f32 %v2269_v61, %v2268_v55  ;;  %v2271_v0 = vpop.f32.mrb[34].mxu0 }
 0x14d   : > { %v2334_v50 = vadd.f32 %v2333_v59, %v2332_v48  ;;  %v2335_v52 = vpop.f32.mrb[34].mxu1  ;;  %v2272_v2 = vpop.f32.mrb[35].mxu0 }
 0x14e   : > { %v2336_v44 = vpop.f32.mrb[35].mxu1  ;;  %v1480_v3 = vadd.f32 %v2270_v63, %v3309_v56  ;;  %v2273_v4 = vadd.f32 %v2272_v2, %v2271_v0 }
 0x14f   : > { %v2337_v58 = vadd.f32 %v2336_v44, %v2335_v52 }
 0x150   : > { %v1483_v41 = vadd.f32 %v2273_v4, %v3311_v62  ;;  %v3357_v11 = vadd.f32 %v2334_v50, %v1480_v3 }
 0x152   : > { %v2274_v15 = vpop.f32.mrb[36].mxu0  ;;  %v3359_v22 = vadd.f32 %v2337_v58, %v1483_v41 }
 0x153   : > { %v2338_v5 = vpop.f32.mrb[36].mxu1  ;;  %v2275_v23 = vpop.f32.mrb[37].mxu0 }
 0x154   : > { %v2339_v6 = vpop.f32.mrb[37].mxu1  ;;  %v2276_v24 = vadd.f32 %v2275_v23, %v2274_v15  ;;  %v2277_v26 = vpop.f32.mrb[38].mxu0 }
 0x155   : > { %v2340_v7 = vadd.f32 %v2339_v6, %v2338_v5  ;;  %v2341_v8 = vpop.f32.mrb[38].mxu1  ;;  %v2278_v27 = vpop.f32.mrb[39].mxu0 }
 0x156   : > { %v2342_v13 = vpop.f32.mrb[39].mxu1  ;;  %v1488_v56 = vadd.f32 %v2276_v24, %v3315_v12  ;;  %v2279_v29 = vadd.f32 %v2278_v27, %v2277_v26 }
 0x157   : > { %v2343_v18 = vadd.f32 %v2342_v13, %v2341_v8 }
 0x158   : > { %v1491_v62 = vadd.f32 %v2279_v29, %v3317_v19  ;;  %v3363_v33 = vadd.f32 %v2340_v7, %v1488_v56 }
 0x15a   : > { %v2280_v32 = vpop.f32.mrb[40].mxu0  ;;  %v3365_v35 = vadd.f32 %v2343_v18, %v1491_v62 }
 0x15b   : > { %v2344_v30 = vpop.f32.mrb[40].mxu1  ;;  %v2281_v51 = vpop.f32.mrb[41].mxu0 }
 0x15c   : > { %v2345_v14 = vpop.f32.mrb[41].mxu1  ;;  %v2282_v36 = vadd.f32 %v2281_v51, %v2280_v32  ;;  %v2283_v17 = vpop.f32.mrb[42].mxu0 }
 0x15d   : > { %v2346_v57 = vadd.f32 %v2345_v14, %v2344_v30  ;;  %v2347_v10 = vpop.f32.mrb[42].mxu1  ;;  %v2284_v37 = vpop.f32.mrb[43].mxu0 }
 0x15e   : > { %v2348_v28 = vpop.f32.mrb[43].mxu1  ;;  %v1496_v12 = vadd.f32 %v2282_v36, %v3321_v9  ;;  %v2285_v38 = vadd.f32 %v2284_v37, %v2283_v17 }
 0x15f   : > { %v2349_v54 = vadd.f32 %v2348_v28, %v2347_v10 }
 0x160   : > { %v1499_v19 = vadd.f32 %v2285_v38, %v3323_v31  ;;  %v3369_v47 = vadd.f32 %v2346_v57, %v1496_v12 }
 0x162   : > { %v2286_v59 = vpop.f32.mrb[44].mxu0  ;;  %v3371_v50 = vadd.f32 %v2349_v54, %v1499_v19 }
 0x163   : > { %v2350_v40 = vpop.f32.mrb[44].mxu1  ;;  %v2287_v52 = vpop.f32.mrb[45].mxu0 }
 0x164   : > { %v2351_v43 = vpop.f32.mrb[45].mxu1  ;;  %v2288_v44 = vadd.f32 %v2287_v52, %v2286_v59  ;;  %v2289_v55 = vpop.f32.mrb[46].mxu0 }
 0x165   : > { %v2352_v39 = vadd.f32 %v2351_v43, %v2350_v40  ;;  %v2353_v45 = vpop.f32.mrb[46].mxu1  ;;  %v2290_v58 = vpop.f32.mrb[47].mxu0 }
 0x166   : > { %v2354_v48 = vpop.f32.mrb[47].mxu1  ;;  %v1504_v9 = vadd.f32 %v2288_v44, %v3327_v42  ;;  %v2291_v61 = vadd.f32 %v2290_v58, %v2289_v55 }
 0x167   : > { %v2355_v49 = vadd.f32 %v2354_v48, %v2353_v45 }
 0x168   : > { %v1507_v31 = vadd.f32 %v2291_v61, %v3329_v46  ;;  %v3375_v4 = vadd.f32 %v2352_v39, %v1504_v9 }
 0x16a   : > { %v2292_v6 = vpop.f32.mrb[48].mxu0  ;;  %v3377_v7 = vadd.f32 %v2355_v49, %v1507_v31 }
 0x16b   : > { %v2356_v63 = vpop.f32.mrb[48].mxu1  ;;  %v2293_v8 = vpop.f32.mrb[49].mxu0 }
 0x16c   : > { %v2357_v0 = vpop.f32.mrb[49].mxu1  ;;  %v2294_v13 = vadd.f32 %v2293_v8, %v2292_v6  ;;  %v2295_v15 = vpop.f32.mrb[50].mxu0 }
 0x16d   : > { %v2358_v2 = vadd.f32 %v2357_v0, %v2356_v63  ;;  %v2359_v3 = vpop.f32.mrb[50].mxu1  ;;  %v2296_v18 = vpop.f32.mrb[51].mxu0 }
 0x16e   : > { %v2360_v5 = vpop.f32.mrb[51].mxu1  ;;  %v1512_v42 = vadd.f32 %v2294_v13, %v3333_v60  ;;  %v2297_v23 = vadd.f32 %v2296_v18, %v2295_v15 }
 0x16f   : > { %v2361_v41 = vadd.f32 %v2360_v5, %v2359_v3 }
 0x170   : > { %v1515_v46 = vadd.f32 %v2297_v23, %v3335_v1  ;;  %v1609_v29 = vadd.f32 %v2358_v2, %v1512_v42 }
 0x172   : > { %v2298_v14 = vpop.f32.mrb[52].mxu0  ;;  %v1612_v57 = vadd.f32 %v2361_v41, %v1515_v46 }
 0x173   : > { %v2362_v24 = vpop.f32.mrb[52].mxu1  ;;  %v2299_v10 = vpop.f32.mrb[53].mxu0 }
 0x174   : > { %v2363_v26 = vpop.f32.mrb[53].mxu1  ;;  %v2300_v28 = vadd.f32 %v2299_v10, %v2298_v14  ;;  %v2301_v32 = vpop.f32.mrb[54].mxu0 }
 0x175   : > { %v2364_v27 = vadd.f32 %v2363_v26, %v2362_v24  ;;  %v2365_v56 = vpop.f32.mrb[54].mxu1  ;;  %v2302_v54 = vpop.f32.mrb[55].mxu0 }
 0x176   : > { %v2366_v30 = vpop.f32.mrb[55].mxu1  ;;  %v1520_v51 = vadd.f32 %v2300_v28, %v3339_v20  ;;  %v2303_v36 = vadd.f32 %v2302_v54, %v2301_v32 }
 0x177   : > { %v2367_v62 = vadd.f32 %v2366_v30, %v2365_v56 }
 0x178   : > { %v1523_v37 = vadd.f32 %v2303_v36, %v3341_v25  ;;  %v1617_v38 = vadd.f32 %v2364_v27, %v1520_v51 }
 0x17a   : > { %v2304_v43 = vpop.f32.mrb[56].mxu0  ;;  %v1620_v39 = vadd.f32 %v2367_v62, %v1523_v37 }
 0x17b   : > { %v2368_v60 = vpop.f32.mrb[56].mxu1  ;;  %v2305_v45 = vpop.f32.mrb[57].mxu0 }
 0x17c   : > { %v2369_v17 = vpop.f32.mrb[57].mxu1  ;;  %v2306_v48 = vadd.f32 %v2305_v45, %v2304_v43  ;;  %v2307_v59 = vpop.f32.mrb[58].mxu0 }
 0x17d   : > { %v2370_v12 = vadd.f32 %v2369_v17, %v2368_v60  ;;  %v2371_v1 = vpop.f32.mrb[58].mxu1  ;;  %v2308_v49 = vpop.f32.mrb[59].mxu0 }
 0x17e   : > { %v2372_v40 = vpop.f32.mrb[59].mxu1  ;;  %v1528_v52 = vadd.f32 %v2306_v48, %v3345_v34  ;;  %v2309_v20 = vadd.f32 %v2308_v49, %v2307_v59 }
 0x17f   : > { %v2373_v19 = vadd.f32 %v2372_v40, %v2371_v1 }
 0x180   : > { %v1531_v58 = vadd.f32 %v2309_v20, %v3347_v16  ;;  %v1625_v61 = vadd.f32 %v2370_v12, %v1528_v52 }
 0x182   : > { %v2310_v0 = vpop.f32.mrb[60].mxu0  ;;  %v1628_v2 = vadd.f32 %v2373_v19, %v1531_v58 }
 0x183   : > { %v2374_v44 = vpop.f32.mrb[60].mxu1  ;;  %v2311_v3 = vpop.f32.mrb[61].mxu0 }
 0x184   : > { %v2375_v55 = vpop.f32.mrb[61].mxu1  ;;  %v2312_v5 = vadd.f32 %v2311_v3, %v2310_v0  ;;  %v2313_v6 = vpop.f32.mrb[62].mxu0 }
 0x185   : > { %v2376_v25 = vadd.f32 %v2375_v55, %v2374_v44  ;;  %v2377_v9 = vpop.f32.mrb[62].mxu1  ;;  %v2314_v34 = vpop.f32.mrb[63].mxu0 }
 0x186   : > { %v2378_v63 = vpop.f32.mrb[63].mxu1  ;;  %v1536_v41 = vadd.f32 %v2312_v5, %v3351_v21  ;;  %v2315_v8 = vadd.f32 %v2314_v34, %v2313_v6 }
 0x187   : > { %v2379_v31 = vadd.f32 %v2378_v63, %v2377_v9 }
 0x188   : > { %v1539_v18 = vadd.f32 %v2315_v8, %v3353_v53  ;;  %v1633_v24 = vadd.f32 %v2376_v25, %v1536_v41 }
 0x18a   : > { %v2414_v53 = vpop.f32.mrb[64].mxu0  ;;  %v1636_v27 = vadd.f32 %v2379_v31, %v1539_v18 }
 0x18b   : > { %v2422_v13 = vpop.f32.mrb[64].mxu1  ;;  %v1682_v56 = vadd.f32 %v2414_v53, %v3363_v33 }
 0x18c   : > { %v3390_v16 = vadd.f32 %v2422_v13, %v1617_v38  ;;  %v1705_v15 = vpop.f32.mrb[65].mxu1 }
 0x18d   : > { %v3393_v42 = vadd.f32 %v1705_v15, %v1609_v29  ;;  %v2423_v23 = vpop.f32.mrb[66].mxu1  ;;  %v1673_v29 = vpop.f32.mrb[65].mxu0  ;;  %1738 = vst [vmem:[%s3395_s16 + $0x10] sm:$0xff] %v1682_v56  ;;  %v1775_v17 = vmul.f32 %v1682_v56, %v1682_v56 }
 0x18e   : > { %1746 = vst [vmem:[%s3395_s16 + $0x50] sm:$0xff] %v3390_v16  ;;  %v3399_v21 = vadd.f32 %v2423_v23, %v1620_v39  ;;  %v1708_v26 = vpop.f32.mrb[67].mxu1  ;;  %v1674_v30 = vadd.f32 %v1673_v29, %v3357_v11  ;;  %v2415_v14 = vpop.f32.mrb[66].mxu0 }
 0x18f   : > { %1744 = vst [vmem:[%s3395_s16 + $0x40] sm:$0xff] %v3393_v42  ;;  %v3403_v46 = vadd.f32 %v1708_v26, %v1612_v57  ;;  %v1685_v62 = vadd.f32 %v2415_v14, %v3365_v35  ;;  %v1676_v57 = vpop.f32.mrb[67].mxu0 }
 0x190   : > { %1747 = vst [vmem:[%s3395_s16 + $0x58] sm:$0xff] %v3399_v21  ;;  %1736 = vst [vmem:[%s3395_s16] sm:$0xff] %v1674_v30  ;;  %v1677_v10 = vadd.f32 %v1676_v57, %v3359_v22  ;;  %v1773_v32 = vmul.f32 %v1674_v30, %v1674_v30 }
 0x191   : > { %1745 = vst [vmem:[%s3395_s16 + $0x48] sm:$0xff] %v3403_v46  ;;  %1739 = vst [vmem:[%s3395_s16 + $0x18] sm:$0xff] %v1685_v62  ;;  %v1776_v19 = vmul.f32 %v1685_v62, %v1685_v62 }
 0x192   : > { %1737 = vst [vmem:[%s3395_s16 + $0x8] sm:$0xff] %v1677_v10  ;;  %v1752_v54 = vadd.f32 %v1677_v10, %v1674_v30  ;;  %v1774_v51 = vmul.f32 %v1677_v10, %v1677_v10  ;;  %v2418_v1 = vpop.f32.mrb[68].mxu0 }
 0x193   : > { %v2426_v33 = vpop.f32.mrb[68].mxu1  ;;  %v1698_v40 = vadd.f32 %v2418_v1, %v3375_v4  ;;  %v1689_v43 = vpop.f32.mrb[69].mxu0 }
 0x194   : > { %v3418_v28 = vadd.f32 %v2426_v33, %v1633_v24  ;;  %v1721_v11 = vpop.f32.mrb[69].mxu1  ;;  %v1753_v37 = vadd.f32 %v1752_v54, %v1682_v56  ;;  %v1789_v12 = vadd.f32 %v1774_v51, %v1773_v32  ;;  %v1690_v45 = vadd.f32 %v1689_v43, %v3369_v47  ;;  %v2419_v59 = vpop.f32.mrb[70].mxu0 }
 0x195   : > { %v3423_v35 = vadd.f32 %v1721_v11, %v1625_v61  ;;  %v2427_v36 = vpop.f32.mrb[70].mxu1  ;;  %1742 = vst [vmem:[%s3395_s16 + $0x30] sm:$0xff] %v1698_v40  ;;  %v1701_v49 = vadd.f32 %v2419_v59, %v3377_v7  ;;  %v1692_v52 = vpop.f32.mrb[71].mxu0 }
 0x196   : > { %1750 = vst [vmem:[%s3395_s16 + $0x70] sm:$0xff] %v3418_v28  ;;  %v3427_v22 = vadd.f32 %v2427_v36, %v1636_v27  ;;  %v1724_v60 = vpop.f32.mrb[71].mxu1  ;;  %v1790_v39 = vadd.f32 %v1789_v12, %v1775_v17  ;;  %v1754_v48 = vadd.f32 %v1753_v37, %v1685_v62  ;;  %1740 = vst [vmem:[%s3395_s16 + $0x20] sm:$0xff] %v1690_v45 }
 0x197   : > { %1748 = vst [vmem:[%s3395_s16 + $0x60] sm:$0xff] %v3423_v35  ;;  %v3431_v38 = vadd.f32 %v1724_v60, %v1628_v2  ;;  %v1777_v4 = vmul.f32 %v1690_v45, %v1690_v45  ;;  %v1693_v44 = vadd.f32 %v1692_v52, %v3371_v50  ;;  %1743 = vst [vmem:[%s3395_s16 + $0x38] sm:$0xff] %v1701_v49 }
 0x198   : > { %1751 = vst [vmem:[%s3395_s16 + $0x78] sm:$0xff] %v3427_v22  ;;  %v1755_v47 = vadd.f32 %v1754_v48, %v1690_v45  ;;  %v1791_v20 = vadd.f32 %v1790_v39, %v1776_v19 }
 0x199   : > { %1749 = vst [vmem:[%s3395_s16 + $0x68] sm:$0xff] %v3431_v38  ;;  %1741 = vst [vmem:[%s3395_s16 + $0x28] sm:$0xff] %v1693_v44  ;;  %v1778_v58 = vmul.f32 %v1693_v44, %v1693_v44 }
 0x19a   : > { %v1792_v7 = vadd.f32 %v1791_v20, %v1777_v4  ;;  %v1756_v55 = vadd.f32 %v1755_v47, %v1693_v44 }
 0x19b   : > { %2611 = shalt.err (!%p2608_p10)
}
 0x19c   : > { %s2612_s16 = scalar_lea.hbm %s3446_s19, 2048  ;;  %s2616_s14 = scalar_lea.hbm %s3567_s5, 8192 }
 0x19d   : > { %p2613_p11 = scmp.ne.s32.totalorder %s3446_s19, %s2612_s16  ;;  %p2617_p0 = scmp.lt.u32.totalorder %s3446_s19, %s3567_s5 }
 0x19e   : > { %p2618_p1 = scmp.lt.u32.totalorder %s2616_s14, %s2612_s16  ;;  %p2620_p4 = scmp.lt.u32.totalorder %s2612_s16, %s3446_s19 }
 0x19f   : > { %p2614_p12 = pnand %p2613_p11, %p2816_p3 }
 0x1a0   : > { %p2619_p2 = por %p2618_p1, %p2617_p0 }
 0x1a1   : > { %p2615_p13 = pneg %p2614_p12 }
 0x1a2   : > { %p2621_p5 = por %p2620_p4, %p2619_p2 }
 0x1a4   : > { %p2622_p6 = pnand %p2621_p5, %p2615_p13 }
 0x1a6   : > { %2625 = shalt.err (!%p2622_p6)
}
 0x1a7   : > { %s2727_s27 = smov 128   ;;  %s2728_s7 = smov 8   ;;  %v1779_v50 = vmul.f32 %v1698_v40, %v1698_v40  ;;  %v1757_v25 = vadd.f32 %v1756_v55, %v1698_v40  ;;  %v1793_v9 = vadd.f32 %v1792_v7, %v1778_v58  ;;  %v1780_v61 = vmul.f32 %v1701_v49, %v1701_v49 }
 0x1a8   : > { %2448 = dma.vmem_to_hbm [thread:$0]  (%p2816_p3), %s3448_s13, 2048, %s3446_s19, %s1814_s9, %s2727_s27, %s2727_s27, %s2728_s7   ;;  %v1781_v31 = vmul.f32 %v3393_v42, %v3393_v42  ;;  %v1782_v5 = vmul.f32 %v3403_v46, %v3403_v46  ;;  %v1783_v41 = vmul.f32 %v3390_v16, %v3390_v16  ;;  %v1784_v15 = vmul.f32 %v3399_v21, %v3399_v21 }
 0x1a9   : > { %v1758_v63 = vadd.f32 %v1757_v25, %v1701_v49  ;;  %v1794_v0 = vadd.f32 %v1793_v9, %v1779_v50  ;;  %v1787_v27 = vmul.f32 %v3418_v28, %v3418_v28  ;;  %v1788_v29 = vmul.f32 %v3427_v22, %v3427_v22  ;;  %s2021_s13 = sshll.u32 %s3386_s8, 1  ;;  %s2107_s19 = sshll.u32 %s2712_s25, 1 }
 0x1aa   : > { %s1849_s9 = sadd.s32 %s2708_s24, %s2107_s19  ;;  %s374_s12 = scalar_lea.vmem [#allocation4], %s2021_s13  ;;  %vm1810_vm2 = vcmask 1040384  }
 0x1ab   : > { %v1759_v2 = vadd.f32 %v1758_v63, %v3393_v42  ;;  %v1795_v3 = vadd.f32 %v1794_v0, %v1780_v61  ;;  %v1785_v42 = vmul.f32 %v3423_v35, %v3423_v35  ;;  %s2108_s30 = sshll.u32 %s1849_s9, 5  ;;  %s1853_s16 = sshll.u32 %s374_s12, 4  ;;  %s3510_s16 = int_to_ptr.vmem [resolvable:$true] %s1853_s16 }
 0x1ac   : > { %s3508_s14 = scalar_lea.hbm %s3568_s6, %s2108_s30  ;;  %s1819_s24 = scalar_lea.sflag [#allocation5], %s3386_s8 }
 0x1ad   : > { %v1796_v6 = vadd.f32 %v1795_v3, %v1781_v31  ;;  %v1760_v34 = vadd.f32 %v1759_v2, %v3403_v46  ;;  %s2626_s25 = scalar_lea.vmem %s3510_s16, 32  ;;  %s2729_s18 = smov [#allocation4]  }
 0x1ae   : > { %p2627_p7 = scmp.ne.s32.totalorder %s3510_s16, %s2626_s25  ;;  %s2630_s29 = sshll.u32 %s2729_s18, 4  ;;  %s2631_s29 = int_to_ptr.vmem [resolvable:$false] %s2630_s29 }
 0x1af   : > { %v1761_v8 = vadd.f32 %v1760_v34, %v3390_v16  ;;  %v1797_v13 = vadd.f32 %v1796_v6, %v1782_v5  ;;  %v1786_v16 = vmul.f32 %v3431_v38, %v3431_v38  ;;  %s2632_s27 = scalar_lea.vmem %s2631_s29, 64  ;;  %p2633_p11 = scmp.lt.s32.totalorder %s3510_s16, %s2631_s29 }
 0x1b0   : > { %p2628_p9 = pnand %p2627_p7, %p2816_p3  ;;  %p2634_p12 = scmp.lt.s32.totalorder %s2632_s27, %s2626_s25 }
 0x1b1   : > { %v1762_v18 = vadd.f32 %v1761_v8, %v3399_v21  ;;  %v1798_v23 = vadd.f32 %v1797_v13, %v1783_v41 }
 0x1b2   : > { %p2629_p10 = pneg %p2628_p9  ;;  %p2635_p13 = por %p2634_p12, %p2633_p11 }
 0x1b3   : > { %v1763_v24 = vadd.f32 %v1762_v18, %v3423_v35  ;;  %v1799_v26 = vadd.f32 %v1798_v23, %v1784_v15 }
 0x1b4   : > { %p2636_p0 = pnand %p2635_p13, %p2629_p10 }
 0x1b5   : > { %v1764_v53 = vadd.f32 %v1763_v24, %v3431_v38  ;;  %v1800_v46 = vadd.f32 %v1799_v26, %v1785_v42 }
 0x1b7   : > { %v1765_v21 = vadd.f32 %v1764_v53, %v3418_v28  ;;  %v1801_v56 = vadd.f32 %v1800_v46, %v1786_v16 }
 0x1b9   : > { %v1766_v30 = vadd.f32 %v1765_v21, %v3427_v22  ;;  %v1802_v14 = vadd.f32 %v1801_v56, %v1787_v27 }
 0x1bb   : > { %v1767_v62 = vrot.slane %v1766_v30, 4  ;;  %v1803_v57 = vadd.f32 %v1802_v14, %v1788_v29 }
 0x1bd   : > { %v1768_v10 = vadd.f32 %v1767_v62, %v1766_v30  ;;  %v1804_v33 = vrot.slane %v1803_v57, 4 }
 0x1bf   : > { %v1769_v11 = vrot.slane %v1768_v10, 2  ;;  %v1805_v32 = vadd.f32 %v1804_v33, %v1803_v57 }
 0x1c1   : > { %v1770_v54 = vadd.f32 %v1769_v11, %v1768_v10  ;;  %v1806_v51 = vrot.slane %v1805_v32, 2 }
 0x1c3   : > { %v1771_v28 = vrot.slane %v1770_v54, 1  ;;  %v1807_v35 = vadd.f32 %v1806_v51, %v1805_v32 }
 0x1c5   : > { %v1808_v36 = vrot.slane %v1807_v35, 1  ;;  %v1772_v22 = vadd.f32 %v1771_v28, %v1770_v54 }
 0x1c7   : > { %v1809_v60 = vadd.f32 %v1808_v36, %v1807_v35 }
 0x1c9   : > { %v1811_v17 = vsel %vm1810_vm2, %v1772_v22, %v1809_v60 }
 0x1ca   : > { %1812 = vst [vmem:[%s374_s12] sm:$0x3] %v1811_v17 }
 0x1cb   : > { %2639 = shalt.err (!%p2636_p0)
}
 0x1cc   : > { %s2640_s8 = scalar_lea.hbm %s3508_s14, 32  ;;  %s2644_s19 = scalar_lea.hbm %s3568_s6, 128 }
 0x1cd   : > { %p2641_p1 = scmp.ne.s32.totalorder %s3508_s14, %s2640_s8  ;;  %p2645_p5 = scmp.lt.u32.totalorder %s3508_s14, %s3568_s6 }
 0x1ce   : > { %p2646_p6 = scmp.lt.u32.totalorder %s2644_s19, %s2640_s8  ;;  %p2648_p9 = scmp.lt.u32.totalorder %s2640_s8, %s3508_s14 }
 0x1cf   : > { %p2642_p2 = pnand %p2641_p1, %p2816_p3 }
 0x1d0   : > { %p2647_p7 = por %p2646_p6, %p2645_p5 }
 0x1d1   : > { %p2643_p4 = pneg %p2642_p2 }
 0x1d2   : > { %p2649_p10 = por %p2648_p9, %p2647_p7 }
 0x1d4   : > { %p2650_p11 = pnand %p2649_p10, %p2643_p4 }
 0x1d6   : > { %2653 = shalt.err (!%p2650_p11)
}
 0x1d7   : > { %2449 = dma.vmem_to_hbm [thread:$0]  (%p2816_p3), %s3510_s16, 32, %s3508_s14, %s1819_s24  }
 0x1d8 PF: > { %p2459_p12 = scmp.ge.s32.totalorder %s2724_s28, 2  ;;  %s1865_s12 = sand.u32 1, %s2696_s21  }
 0x1d9   : > { %s1866_s17 = scalar_lea.sflag [#allocation3], %s1865_s12 }
 0x1da   : > { %p2453_p13 = pnand %p2459_p12, %p2825_p8 }
 0x1dc   : > { %2687 = dma.done.wait (!%p2453_p13), %s1866_s17, 2048  }
 0x1dd   : > { %2689 = vsyncadd (!%p2453_p13), %s1866_s17, 4294965248  ;;  %s1875_s20 = scalar_lea.sflag [#allocation5], %s1865_s12 }
 0x1de   : > { %2691 = dma.done.wait (!%p2453_p13), %s1875_s20, 32  }
 0x1df   : > { %2693 = vsyncadd (!%p2453_p13), %s1875_s20, 4294967264  ;;  %s23_s28 = sadd.s32 1, %s2724_s28   ;;  %s3578_s25 = sld [smem:[#allocation8_spill]] }
 0x1e0   : > { %p20_p0 = scmp.ge.s32.totalorder %s23_s28, 6   ;;  %s3579_s10 = sld [smem:[#allocation9_spill]] }
 0x1e1   : > { %s3580_s27 = sld [smem:[#allocation10_spill]]  ;;  %s3581_s21 = smov %s2700_s22 }
 0x1e2   : > { %s3582_s22 = smov %s2704_s23  ;;  %s3583_s23 = smov %s2834_s15 }
 0x1e3   : > { %s3584_s24 = smov %s2716_s26  ;;  %22 = sbr.rel (!%p20_p0) target bundleno = 7 (0x7), region = 98 }
 0x1e6   : > { %s3585_s26 = smov %s3579_s10 }
 0x1ea   :  { %1880 = vsyncpa [#allocation3], 1 }
 0x1eb   :  { %1882 = vsyncpa [#allocation3 + $0x1], 1 }
 0x1ec   :  { %1883 = vsyncpa [#allocation5], 1 }
 0x1ed   :  { %1885 = vsyncpa [#allocation5 + $0x1], 1 }

</bundles_post_ra>
